<compile_context>
chip_gen: v7x
topology: tpu7x:2x2x1
jax: 0.10.0
libtpu: 0.0.40
codegen_flags: <defaults>
</compile_context>

<pallas_src>
import numpy as np
import jax
import jax.numpy as jnp
from jax.experimental import pallas as pl
from jax.experimental.pallas import tpu as pltpu


def _round_up(a, m):
    return (a + m - 1) // m * m


def _kernel(h_ref, mconv_ref, bc_ref, wf_ref, bf_ref, hflat_ref, z_ref):
    # h_ref:     (TB, C_in*E)          embedded rows, flattened (batch in M)
    # mconv_ref: (C_in*E, C_out*W_OUT) dense conv-as-matmul matrix
    # bc_ref:    (1, C_out*W_OUT)      conv bias, flatten order (co-major, w-minor)
    # wf_ref:    (C_out*W_OUT, E)      fc_prot weight (transposed)
    # bf_ref:    (1, E)                fc_prot bias
    conv = jnp.dot(h_ref[...], mconv_ref[...],
                   preferred_element_type=jnp.float32)
    conv = conv + bc_ref[...]                       # one broadcast add per block
    hflat_ref[...] = conv.astype(hflat_ref.dtype)

    z = jnp.dot(conv.astype(wf_ref.dtype), wf_ref[...],
                preferred_element_type=jnp.float32)
    z_ref[...] = (z + bf_ref[...]).astype(z_ref.dtype)


def prot_cnn_forward(x, lengths, embed_table, conv_w, conv_b, fc_w, fc_b,
                     *, compute_dtype=jnp.float32, tb=256):
    """Pallas implementation of PROT_CNN.forward. `lengths` is unused (parity with torch)."""
    del lengths
    B, C_in = x.shape
    _, E = embed_table.shape
    C_out, _, K = conv_w.shape
    W_OUT = E - K + 1                    # must be 93 for the .view(-1, 93*C_out)
    F_IN = C_in * E                      # 768
    F_OUT = C_out * W_OUT                # 744

    # ---- glue: embedding gather + flatten + batch padding ----
    h = embed_table[x].reshape(B, F_IN).astype(jnp.float32)   # (B, C_in*E)
    sub = 8 if jnp.dtype(compute_dtype).itemsize == 4 else 16  # sublane multiple
    TB = min(tb, _round_up(B, sub))
    B_pad = _round_up(B, TB)
    if B_pad != B:
        h = jnp.pad(h, ((0, B_pad - B), (0, 0)))
    h = h.astype(compute_dtype)

    # ---- glue: Conv1d lowered to a dense matrix (conv is linear in h, weights static) ----
    # Mconv[ci*E + e, co*W_OUT + w] = conv_w[co, ci, e - w]  if 0 <= e - w < K else 0
    e_idx = jnp.arange(E)[:, None]                  # (E, 1)
    w_idx = jnp.arange(W_OUT)[None, :]              # (1, W_OUT)
    d = e_idx - w_idx                               # (E, W_OUT)
    valid = (d >= 0) & (d < K)
    taps = jnp.where(valid[None, None],
                     conv_w[:, :, jnp.clip(d, 0, K - 1)], 0.0)   # (C_out, C_in, E, W_OUT)
    mconv = jnp.transpose(taps, (1, 2, 0, 3)).reshape(F_IN, F_OUT).astype(compute_dtype)

    bc = jnp.repeat(conv_b, W_OUT).reshape(1, F_OUT).astype(jnp.float32)  # flatten order
    wf = fc_w.T.reshape(F_OUT, E).astype(compute_dtype)                   # (744, E)
    bf = fc_b.reshape(1, E).astype(jnp.float32)

    grid = (B_pad // TB,)
    hflat, z = pl.pallas_call(
        _kernel,
        out_shape=(jax.ShapeDtypeStruct((B_pad, F_OUT), jnp.float32),
                   jax.ShapeDtypeStruct((B_pad, E), jnp.float32)),
        grid_spec=pltpu.PrefetchScalarGridSpec(
            num_scalar_prefetch=0,
            grid=grid,
            in_specs=[
                pl.BlockSpec((TB, F_IN), lambda b: (b, 0)),        # h slab (per block)
                pl.BlockSpec((F_IN, F_OUT), lambda b: (0, 0)),     # Mconv (resident)
                pl.BlockSpec((1, F_OUT), lambda b: (0, 0)),        # conv bias
                pl.BlockSpec((F_OUT, E), lambda b: (0, 0)),        # fc weight (resident)
                pl.BlockSpec((1, E), lambda b: (0, 0)),            # fc bias
            ],
            out_specs=[
                pl.BlockSpec((TB, F_OUT), lambda b: (b, 0)),       # flattened conv out
                pl.BlockSpec((TB, E), lambda b: (b, 0)),           # z (per block)
            ],
        ),
        compiler_params=pltpu.CompilerParams(
            dimension_semantics=("parallel",)),                    # megacore on v7x
    )(h, mconv, bc, wf, bf)

    return hflat[:B], z[:B]


def prot_cnn_reference(x, embed_table, conv_w, conv_b, fc_w, fc_b):
    """Pure-JAX reference matching the PyTorch forward semantics."""
    h = embed_table[x].astype(jnp.float32)               # (B, C_in, E)
    C_out, _, K = conv_w.shape
    W_OUT = h.shape[-1] - K + 1
    out = jnp.zeros((x.shape[0], C_out, W_OUT), jnp.float32)
    for k in range(K):
        out = out + jnp.einsum('bie,oi->boe', h[:, :, k:k + W_OUT], conv_w[:, :, k])
    out = out + conv_b[None, :, None]
    h_flat = out.reshape(x.shape[0], -1)
    z = h_flat @ fc_w.T + fc_b
    return h_flat, z


if __name__ == "__main__":
    # hp: prot_embedding_dim=96, cnn_prot_length=6 (seq_len=8), cnn_out_channels=8,
    #     cnn_kernel_size=4  -> conv output width = 96 - 4 + 1 = 93 (required by the view)
    B = 2
    input_dim = 25                # vocab size; padding_idx = input_dim - 1
    E = 96                        # prot_embedding_dim
    seq_len = 8                   # cnn_prot_length + 2  (Conv1d in_channels)
    C_out = 8                     # cnn_out_channels
    K = 4                         # cnn_kernel_size
    W_OUT = E - K + 1             # 93

    key = jax.random.PRNGKey(0)
    k_emb, k_cw, k_cb, k_fw, k_fb, k_x = jax.random.split(key, 6)

    embed_table = 0.1 * jax.random.normal(k_emb, (input_dim, E), jnp.float32)
    embed_table = embed_table.at[input_dim - 1].set(0.0)   # padding_idx row = 0
    conv_w = 0.1 * jax.random.normal(k_cw, (C_out, seq_len, K), jnp.float32)
    conv_b = 0.1 * jax.random.normal(k_cb, (C_out,), jnp.float32)
    fc_w = 0.05 * jax.random.normal(k_fw, (E, W_OUT * C_out), jnp.float32)  # nn.Linear weight
    fc_b = 0.05 * jax.random.normal(k_fb, (E,), jnp.float32)

    x = jax.random.randint(k_x, (B, seq_len), 0, input_dim, dtype=jnp.int32)
    lengths = jnp.full((B,), seq_len, dtype=jnp.int32)      # unused by forward (parity)

    h_ref, z_ref = prot_cnn_reference(x, embed_table, conv_w, conv_b, fc_w, fc_b)

    # float32 operand path: tight tolerance against the reference.
    h_f32, z_f32 = prot_cnn_forward(x, lengths, embed_table, conv_w, conv_b, fc_w, fc_b,
                                    compute_dtype=jnp.float32)
    jax.block_until_ready((h_f32, z_f32))
    assert h_f32.shape == (B, C_out * W_OUT) and z_f32.shape == (B, E)
    np.testing.assert_allclose(np.asarray(h_f32), np.asarray(h_ref), rtol=1e-4, atol=1e-4)
    np.testing.assert_allclose(np.asarray(z_f32), np.asarray(z_ref), rtol=1e-4, atol=1e-4)

    # bfloat16 operand path (MXU-peak on v6e/v7x), float32 accumulation: loose tolerance.
    h_bf, z_bf = prot_cnn_forward(x, lengths, embed_table, conv_w, conv_b, fc_w, fc_b,
                                  compute_dtype=jnp.bfloat16)
    jax.block_until_ready((h_bf, z_bf))
    np.testing.assert_allclose(np.asarray(h_bf), np.asarray(h_ref), rtol=2e-2, atol=2e-2)
    np.testing.assert_allclose(np.asarray(z_bf), np.asarray(z_ref), rtol=2e-2, atol=2e-2)

    print("KERNEL_OK")
</pallas_src>

<mosaic_0001>
module attributes {stable_mosaic.version = 11 : i64} {
  func.func @_kernel(%arg0: i32, %arg1: memref<8x768xf32, #tpu.memory_space<vmem>>, %arg2: memref<768x744xf32, #tpu.memory_space<vmem>>, %arg3: memref<1x744xf32, #tpu.memory_space<vmem>>, %arg4: memref<744x96xf32, #tpu.memory_space<vmem>>, %arg5: memref<1x96xf32, #tpu.memory_space<vmem>>, %arg6: memref<8x744xf32, #tpu.memory_space<vmem>>, %arg7: memref<8x96xf32, #tpu.memory_space<vmem>>) attributes {dimension_semantics = [#tpu.dimension_semantics<parallel>], iteration_bounds = array<i64: 1>, scalar_prefetch = 0 : i64, scratch_operands = 0 : i64, tpu.core_type = #tpu.core_type<tc>, window_params = [{transform_indices = @transform_0, window_bounds = array<i64: 8, 768>}, {pipeline_mode = #tpu.pipeline_mode<synchronous>, transform_indices = @transform_1, window_bounds = array<i64: 768, 744>}, {pipeline_mode = #tpu.pipeline_mode<synchronous>, transform_indices = @transform_2, window_bounds = array<i64: 1, 744>}, {pipeline_mode = #tpu.pipeline_mode<synchronous>, transform_indices = @transform_3, window_bounds = array<i64: 744, 96>}, {pipeline_mode = #tpu.pipeline_mode<synchronous>, transform_indices = @transform_4, window_bounds = array<i64: 1, 96>}, {transform_indices = @transform_5, window_bounds = array<i64: 8, 744>}, {transform_indices = @transform_6, window_bounds = array<i64: 8, 96>}]} {
    %c0 = arith.constant 0 : index
    %c0_0 = arith.constant 0 : index
    %0 = vector.load %arg1[%c0, %c0_0] : memref<8x768xf32, #tpu.memory_space<vmem>>, vector<8x768xf32>
    %c0_1 = arith.constant 0 : index
    %c0_2 = arith.constant 0 : index
    %1 = vector.load %arg2[%c0_1, %c0_2] : memref<768x744xf32, #tpu.memory_space<vmem>>, vector<768x744xf32>
    %cst = arith.constant dense<0.000000e+00> : vector<8x744xf32>
    %2 = tpu.matmul %0, %1, %cst {dimension_numbers = #tpu.dot_dimension_numbers<[1], [0], [0], [1], [0, 0, 1, 1], [], []>} : vector<8x768xf32>, vector<768x744xf32>, vector<8x744xf32> -> vector<8x744xf32>
    %c0_3 = arith.constant 0 : index
    %c0_4 = arith.constant 0 : index
    %3 = vector.load %arg3[%c0_3, %c0_4] : memref<1x744xf32, #tpu.memory_space<vmem>>, vector<1x744xf32>
    %4 = vector.broadcast %3 : vector<1x744xf32> to vector<8x744xf32>
    %5 = arith.addf %2, %4 : vector<8x744xf32>
    %c0_5 = arith.constant 0 : index
    %c0_6 = arith.constant 0 : index
    %6 = vector.load %arg6[%c0_5, %c0_6] : memref<8x744xf32, #tpu.memory_space<vmem>>, vector<8x744xf32>
    tpu.vector_store %arg6[%c0_5, %c0_6], %5 {strides = array<i32>} : memref<8x744xf32, #tpu.memory_space<vmem>>, vector<8x744xf32>,
    %c0_7 = arith.constant 0 : index
    %c0_8 = arith.constant 0 : index
    %7 = vector.load %arg4[%c0_7, %c0_8] : memref<744x96xf32, #tpu.memory_space<vmem>>, vector<744x96xf32>
    %cst_9 = arith.constant dense<0.000000e+00> : vector<8x96xf32>
    %8 = tpu.matmul %5, %7, %cst_9 {dimension_numbers = #tpu.dot_dimension_numbers<[1], [0], [0], [1], [0, 0, 1, 1], [], []>} : vector<8x744xf32>, vector<744x96xf32>, vector<8x96xf32> -> vector<8x96xf32>
    %c0_10 = arith.constant 0 : index
    %c0_11 = arith.constant 0 : index
    %9 = vector.load %arg5[%c0_10, %c0_11] : memref<1x96xf32, #tpu.memory_space<vmem>>, vector<1x96xf32>
    %10 = vector.broadcast %9 : vector<1x96xf32> to vector<8x96xf32>
    %11 = arith.addf %8, %10 : vector<8x96xf32>
    %c0_12 = arith.constant 0 : index
    %c0_13 = arith.constant 0 : index
    %12 = vector.load %arg7[%c0_12, %c0_13] : memref<8x96xf32, #tpu.memory_space<vmem>>, vector<8x96xf32>
    tpu.vector_store %arg7[%c0_12, %c0_13], %11 {strides = array<i32>} : memref<8x96xf32, #tpu.memory_space<vmem>>, vector<8x96xf32>,
    return
  }
  func.func @transform_0(%arg0: i32) -> (i32, i32) {
    %c0_i32 = arith.constant 0 : i32
    %c0_i32_0 = arith.constant 0 : i32
    return %arg0, %c0_i32 : i32, i32
  }
  func.func @transform_1(%arg0: i32) -> (i32, i32) {
    %c0_i32 = arith.constant 0 : i32
    %c0_i32_0 = arith.constant 0 : i32
    %c0_i32_1 = arith.constant 0 : i32
    return %c0_i32, %c0_i32_0 : i32, i32
  }
  func.func @transform_2(%arg0: i32) -> (i32, i32) {
    %c0_i32 = arith.constant 0 : i32
    %c0_i32_0 = arith.constant 0 : i32
    %c0_i32_1 = arith.constant 0 : i32
    return %c0_i32, %c0_i32_0 : i32, i32
  }
  func.func @transform_3(%arg0: i32) -> (i32, i32) {
    %c0_i32 = arith.constant 0 : i32
    %c0_i32_0 = arith.constant 0 : i32
    %c0_i32_1 = arith.constant 0 : i32
    return %c0_i32, %c0_i32_0 : i32, i32
  }
  func.func @transform_4(%arg0: i32) -> (i32, i32) {
    %c0_i32 = arith.constant 0 : i32
    %c0_i32_0 = arith.constant 0 : i32
    %c0_i32_1 = arith.constant 0 : i32
    return %c0_i32, %c0_i32_0 : i32, i32
  }
  func.func @transform_5(%arg0: i32) -> (i32, i32) {
    %c0_i32 = arith.constant 0 : i32
    %c0_i32_0 = arith.constant 0 : i32
    return %arg0, %c0_i32 : i32, i32
  }
  func.func @transform_6(%arg0: i32) -> (i32, i32) {
    %c0_i32 = arith.constant 0 : i32
    %c0_i32_0 = arith.constant 0 : i32
    return %arg0, %c0_i32 : i32, i32
  }
}

</mosaic_0001>

<bundles_post_ra>
// kernel: tpu_custom_call.1
= control target key start
LH: loop header
LB: loop body
LE: loop exit
PB: predicated region body
PF: predicated region fallthrough
CT: control target
= control target key end

     0   :  { %12 = vsyncpa [#allocation3], 0  ;;  %s4626_s0 = inlined_call_operand.vmem [shape: f32[8,768], index: 0, kind: input, shape index: {}]   ;;  %s4627_s1 = inlined_call_operand.vmem [shape: f32[768,744], index: 1, kind: input, shape index: {}]   ;;  %s4628_s2 = inlined_call_operand.vmem [shape: f32[1,744], index: 2, kind: input, shape index: {}]   ;;  %s4629_s3 = inlined_call_operand.vmem [shape: f32[744,96], index: 3, kind: input, shape index: {}]   ;;  %s4630_s4 = inlined_call_operand.vmem [shape: f32[1,96], index: 4, kind: input, shape index: {}]   ;;  %s4631_s5 = inlined_call_operand.hbm [shape: f32[8,744], index: 5, kind: output, shape index: {0}]   ;;  %s4632_s6 = inlined_call_operand.hbm [shape: f32[8,96], index: 6, kind: output, shape index: {1}]  }
   0x1   :  { %v31_v0 = vld [vmem:[%s4627_s1 + $0x8] sm:$0xff]  ;;  %v37_v1 = vld [vmem:[%s4627_s1 + $0x38] sm:$0xff]  ;;  %v30_v5 = vld [vmem:[%s4627_s1] sm:$0xff] }
   0x2   :  { %v223_v2 = vld [vmem:[%s4627_s1 + $0x608] sm:$0xff]  ;;  %v1699_v3 = vpack.c.bf16 %v37_v1, %v31_v0  ;;  %v229_v4 = vld [vmem:[%s4627_s1 + $0x638] sm:$0xff]  ;;  %v36_v6 = vld [vmem:[%s4627_s1 + $0x30] sm:$0xff] }
   0x3   :  { %v1763_v7 = vpack.c.bf16 %v229_v4, %v223_v2  ;;  %v1701_v8 = vpack.c.bf16 %v36_v6, %v30_v5  ;;  %v222_v9 = vld [vmem:[%s4627_s1 + $0x600] sm:$0xff]  ;;  %v228_v10 = vld [vmem:[%s4627_s1 + $0x630] sm:$0xff]  ;;  %v43_v11 = vld [vmem:[%s4627_s1 + $0x68] sm:$0xff] }
   0x4   :  { %1700 = vmatprep.subr.bf16.mxu1 %v1699_v3  ;;  %v1765_v12 = vpack.c.bf16 %v228_v10, %v222_v9  ;;  %v49_v13 = vld [vmem:[%s4627_s1 + $0x98] sm:$0xff]  ;;  %v235_v14 = vld [vmem:[%s4627_s1 + $0x668] sm:$0xff]  ;;  %v42_v18 = vld [vmem:[%s4627_s1 + $0x60] sm:$0xff] }
   0x5   :  { %v241_v15 = vld [vmem:[%s4627_s1 + $0x698] sm:$0xff]  ;;  %1764 = vmatprep.subr.bf16.mxu0 %v1763_v7  ;;  %1702 = vmatpush1.bf16.msra.mxu1 %v1701_v8  ;;  %v1703_v16 = vpack.c.bf16 %v49_v13, %v43_v11  ;;  %v48_v19 = vld [vmem:[%s4627_s1 + $0x90] sm:$0xff]  ;;  %v234_v20 = vld [vmem:[%s4627_s1 + $0x660] sm:$0xff] }
   0x6   :  { %v1767_v17 = vpack.c.bf16 %v241_v15, %v235_v14  ;;  %1766 = vmatpush1.bf16.msra.mxu0 %v1765_v12  ;;  %v1705_v21 = vpack.c.bf16 %v48_v19, %v42_v18  ;;  %v240_v22 = vld [vmem:[%s4627_s1 + $0x690] sm:$0xff]  ;;  %v55_v23 = vld [vmem:[%s4627_s1 + $0xc8] sm:$0xff]  ;;  %v61_v24 = vld [vmem:[%s4627_s1 + $0xf8] sm:$0xff] }
   0x7   :  { %1704 = vmatprep.subr.bf16.mxu1 %v1703_v16  ;;  %v1769_v25 = vpack.c.bf16 %v240_v22, %v234_v20  ;;  %v1707_v26 = vpack.c.bf16 %v61_v24, %v55_v23  ;;  %v247_v27 = vld [vmem:[%s4627_s1 + $0x6c8] sm:$0xff]  ;;  %v253_v28 = vld [vmem:[%s4627_s1 + $0x6f8] sm:$0xff]  ;;  %v54_v29 = vld [vmem:[%s4627_s1 + $0xc0] sm:$0xff] }
   0x8   :  { %1768 = vmatprep.subr.bf16.mxu0 %v1767_v17  ;;  %v1771_v30 = vpack.c.bf16 %v253_v28, %v247_v27  ;;  %v60_v31 = vld [vmem:[%s4627_s1 + $0xf0] sm:$0xff]  ;;  %v246_v32 = vld [vmem:[%s4627_s1 + $0x6c0] sm:$0xff]  ;;  %v67_v35 = vld [vmem:[%s4627_s1 + $0x128] sm:$0xff] }
   0x9   :  { %v252_v33 = vld [vmem:[%s4627_s1 + $0x6f0] sm:$0xff]  ;;  %1706 = vmatpush1.bf16.msra.mxu1 %v1705_v21  ;;  %v1709_v34 = vpack.c.bf16 %v60_v31, %v54_v29  ;;  %v73_v36 = vld [vmem:[%s4627_s1 + $0x158] sm:$0xff]  ;;  %v259_v37 = vld [vmem:[%s4627_s1 + $0x728] sm:$0xff] }
   0xa   :  { %1770 = vmatpush1.bf16.msra.mxu0 %v1769_v25  ;;  %1708 = vmatprep.subr.bf16.mxu1 %v1707_v26  ;;  %v1773_v38 = vpack.c.bf16 %v252_v33, %v246_v32  ;;  %v1711_v39 = vpack.c.bf16 %v73_v36, %v67_v35  ;;  %v265_v40 = vld [vmem:[%s4627_s1 + $0x758] sm:$0xff]  ;;  %v66_v41 = vld [vmem:[%s4627_s1 + $0x120] sm:$0xff]  ;;  %v72_v42 = vld [vmem:[%s4627_s1 + $0x150] sm:$0xff] }
   0xb   :  { %1772 = vmatprep.subr.bf16.mxu0 %v1771_v30  ;;  %v1775_v43 = vpack.c.bf16 %v265_v40, %v259_v37  ;;  %v258_v44 = vld [vmem:[%s4627_s1 + $0x720] sm:$0xff]  ;;  %v264_v45 = vld [vmem:[%s4627_s1 + $0x750] sm:$0xff]  ;;  %v79_v46 = vld [vmem:[%s4627_s1 + $0x188] sm:$0xff]  ;;  %v1713_v50 = vpack.c.bf16 %v72_v42, %v66_v41 }
   0xc   :  { %v85_v47 = vld [vmem:[%s4627_s1 + $0x1b8] sm:$0xff]  ;;  %v271_v48 = vld [vmem:[%s4627_s1 + $0x788] sm:$0xff]  ;;  %v1777_v51 = vpack.c.bf16 %v264_v45, %v258_v44  ;;  %v78_v53 = vld [vmem:[%s4627_s1 + $0x180] sm:$0xff] }
   0xd   :  { %v277_v49 = vld [vmem:[%s4627_s1 + $0x7b8] sm:$0xff]  ;;  %1710 = vmatpush1.bf16.msra.mxu1 %v1709_v34  ;;  %v1715_v52 = vpack.c.bf16 %v85_v47, %v79_v46  ;;  %v84_v54 = vld [vmem:[%s4627_s1 + $0x1b0] sm:$0xff]  ;;  %v270_v55 = vld [vmem:[%s4627_s1 + $0x780] sm:$0xff] }
   0xe   :  { %1774 = vmatpush1.bf16.msra.mxu0 %v1773_v38  ;;  %1712 = vmatprep.subr.bf16.mxu1 %v1711_v39  ;;  %v1779_v56 = vpack.c.bf16 %v277_v49, %v271_v48  ;;  %v276_v57 = vld [vmem:[%s4627_s1 + $0x7b0] sm:$0xff]  ;;  %v91_v58 = vld [vmem:[%s4627_s1 + $0x1e8] sm:$0xff]  ;;  %v97_v59 = vld [vmem:[%s4627_s1 + $0x218] sm:$0xff]  ;;  %v1717_v62 = vpack.c.bf16 %v84_v54, %v78_v53 }
   0xf   :  { %1776 = vmatprep.subr.bf16.mxu0 %v1775_v43  ;;  %v283_v60 = vld [vmem:[%s4627_s1 + $0x7e8] sm:$0xff]  ;;  %v289_v61 = vld [vmem:[%s4627_s1 + $0x818] sm:$0xff]  ;;  %v1781_v63 = vpack.c.bf16 %v276_v57, %v270_v55  ;;  %v1719_v0 = vpack.c.bf16 %v97_v59, %v91_v58  ;;  %v90_v1 = vld [vmem:[%s4627_s1 + $0x1e0] sm:$0xff] }
  0x10   :  { %v96_v2 = vld [vmem:[%s4627_s1 + $0x210] sm:$0xff]  ;;  %v282_v3 = vld [vmem:[%s4627_s1 + $0x7e0] sm:$0xff]  ;;  %v1783_v4 = vpack.c.bf16 %v289_v61, %v283_v60  ;;  %v103_v6 = vld [vmem:[%s4627_s1 + $0x248] sm:$0xff] }
  0x11   :  { %1714 = vmatpush1.bf16.msra.mxu1 %v1713_v50  ;;  %v288_v5 = vld [vmem:[%s4627_s1 + $0x810] sm:$0xff]  ;;  %v109_v7 = vld [vmem:[%s4627_s1 + $0x278] sm:$0xff]  ;;  %v295_v8 = vld [vmem:[%s4627_s1 + $0x848] sm:$0xff]  ;;  %v1721_v10 = vpack.c.bf16 %v96_v2, %v90_v1 }
  0x12   :  { %1778 = vmatpush1.bf16.msra.mxu0 %v1777_v51  ;;  %1716 = vmatprep.subr.bf16.mxu1 %v1715_v52  ;;  %v301_v9 = vld [vmem:[%s4627_s1 + $0x878] sm:$0xff]  ;;  %v1785_v11 = vpack.c.bf16 %v288_v5, %v282_v3  ;;  %v1723_v12 = vpack.c.bf16 %v109_v7, %v103_v6  ;;  %v102_v13 = vld [vmem:[%s4627_s1 + $0x240] sm:$0xff]  ;;  %v108_v14 = vld [vmem:[%s4627_s1 + $0x270] sm:$0xff] }
  0x13   :  { %1780 = vmatprep.subr.bf16.mxu0 %v1779_v56  ;;  %v294_v15 = vld [vmem:[%s4627_s1 + $0x840] sm:$0xff]  ;;  %v1787_v16 = vpack.c.bf16 %v301_v9, %v295_v8  ;;  %v300_v17 = vld [vmem:[%s4627_s1 + $0x870] sm:$0xff]  ;;  %v115_v18 = vld [vmem:[%s4627_s1 + $0x2a8] sm:$0xff]  ;;  %v1725_v22 = vpack.c.bf16 %v108_v14, %v102_v13 }
  0x14   :  { %v121_v19 = vld [vmem:[%s4627_s1 + $0x2d8] sm:$0xff]  ;;  %v307_v20 = vld [vmem:[%s4627_s1 + $0x8a8] sm:$0xff]  ;;  %v1789_v23 = vpack.c.bf16 %v300_v17, %v294_v15  ;;  %v114_v25 = vld [vmem:[%s4627_s1 + $0x2a0] sm:$0xff] }
  0x15   :  { %1718 = vmatpush1.bf16.msra.mxu1 %v1717_v62  ;;  %v313_v21 = vld [vmem:[%s4627_s1 + $0x8d8] sm:$0xff]  ;;  %v1727_v24 = vpack.c.bf16 %v121_v19, %v115_v18  ;;  %v120_v26 = vld [vmem:[%s4627_s1 + $0x2d0] sm:$0xff]  ;;  %v306_v27 = vld [vmem:[%s4627_s1 + $0x8a0] sm:$0xff] }
  0x16   :  { %1782 = vmatpush1.bf16.msra.mxu0 %v1781_v63  ;;  %1720 = vmatprep.subr.bf16.mxu1 %v1719_v0  ;;  %v1791_v28 = vpack.c.bf16 %v313_v21, %v307_v20  ;;  %v312_v29 = vld [vmem:[%s4627_s1 + $0x8d0] sm:$0xff]  ;;  %v127_v30 = vld [vmem:[%s4627_s1 + $0x308] sm:$0xff]  ;;  %v133_v31 = vld [vmem:[%s4627_s1 + $0x338] sm:$0xff]  ;;  %v1729_v34 = vpack.c.bf16 %v120_v26, %v114_v25 }
  0x17   :  { %1784 = vmatprep.subr.bf16.mxu0 %v1783_v4  ;;  %v319_v32 = vld [vmem:[%s4627_s1 + $0x908] sm:$0xff]  ;;  %v325_v33 = vld [vmem:[%s4627_s1 + $0x938] sm:$0xff]  ;;  %v1793_v35 = vpack.c.bf16 %v312_v29, %v306_v27  ;;  %v1731_v36 = vpack.c.bf16 %v133_v31, %v127_v30  ;;  %v126_v37 = vld [vmem:[%s4627_s1 + $0x300] sm:$0xff] }
  0x18   :  { %v132_v38 = vld [vmem:[%s4627_s1 + $0x330] sm:$0xff]  ;;  %v318_v39 = vld [vmem:[%s4627_s1 + $0x900] sm:$0xff]  ;;  %v1795_v40 = vpack.c.bf16 %v325_v33, %v319_v32  ;;  %v139_v42 = vld [vmem:[%s4627_s1 + $0x368] sm:$0xff] }
  0x19   :  { %1722 = vmatpush1.bf16.msra.mxu1 %v1721_v10  ;;  %v324_v41 = vld [vmem:[%s4627_s1 + $0x930] sm:$0xff]  ;;  %v145_v43 = vld [vmem:[%s4627_s1 + $0x398] sm:$0xff]  ;;  %v331_v44 = vld [vmem:[%s4627_s1 + $0x968] sm:$0xff]  ;;  %v1733_v46 = vpack.c.bf16 %v132_v38, %v126_v37 }
  0x1a   :  { %1786 = vmatpush1.bf16.msra.mxu0 %v1785_v11  ;;  %1724 = vmatprep.subr.bf16.mxu1 %v1723_v12  ;;  %v337_v45 = vld [vmem:[%s4627_s1 + $0x998] sm:$0xff]  ;;  %v1797_v47 = vpack.c.bf16 %v324_v41, %v318_v39  ;;  %v1735_v48 = vpack.c.bf16 %v145_v43, %v139_v42  ;;  %v138_v49 = vld [vmem:[%s4627_s1 + $0x360] sm:$0xff]  ;;  %v144_v50 = vld [vmem:[%s4627_s1 + $0x390] sm:$0xff] }
  0x1b   :  { %1788 = vmatprep.subr.bf16.mxu0 %v1787_v16  ;;  %v330_v51 = vld [vmem:[%s4627_s1 + $0x960] sm:$0xff]  ;;  %v1799_v52 = vpack.c.bf16 %v337_v45, %v331_v44  ;;  %v336_v53 = vld [vmem:[%s4627_s1 + $0x990] sm:$0xff]  ;;  %v151_v54 = vld [vmem:[%s4627_s1 + $0x3c8] sm:$0xff]  ;;  %v1737_v58 = vpack.c.bf16 %v144_v50, %v138_v49 }
  0x1c   :  { %v157_v55 = vld [vmem:[%s4627_s1 + $0x3f8] sm:$0xff]  ;;  %v343_v56 = vld [vmem:[%s4627_s1 + $0x9c8] sm:$0xff]  ;;  %v1801_v59 = vpack.c.bf16 %v336_v53, %v330_v51  ;;  %v150_v61 = vld [vmem:[%s4627_s1 + $0x3c0] sm:$0xff] }
  0x1d   :  { %1726 = vmatpush1.bf16.msra.mxu1 %v1725_v22  ;;  %v349_v57 = vld [vmem:[%s4627_s1 + $0x9f8] sm:$0xff]  ;;  %v1739_v60 = vpack.c.bf16 %v157_v55, %v151_v54  ;;  %v156_v62 = vld [vmem:[%s4627_s1 + $0x3f0] sm:$0xff]  ;;  %v342_v63 = vld [vmem:[%s4627_s1 + $0x9c0] sm:$0xff] }
  0x1e   :  { %1790 = vmatpush1.bf16.msra.mxu0 %v1789_v23  ;;  %1728 = vmatprep.subr.bf16.mxu1 %v1727_v24  ;;  %v1803_v0 = vpack.c.bf16 %v349_v57, %v343_v56  ;;  %v348_v1 = vld [vmem:[%s4627_s1 + $0x9f0] sm:$0xff]  ;;  %v163_v2 = vld [vmem:[%s4627_s1 + $0x428] sm:$0xff]  ;;  %v169_v3 = vld [vmem:[%s4627_s1 + $0x458] sm:$0xff]  ;;  %v1741_v6 = vpack.c.bf16 %v156_v62, %v150_v61 }
  0x1f   :  { %1792 = vmatprep.subr.bf16.mxu0 %v1791_v28  ;;  %v355_v4 = vld [vmem:[%s4627_s1 + $0xa28] sm:$0xff]  ;;  %v361_v5 = vld [vmem:[%s4627_s1 + $0xa58] sm:$0xff]  ;;  %v162_v7 = vld [vmem:[%s4627_s1 + $0x420] sm:$0xff]  ;;  %v1805_v8 = vpack.c.bf16 %v348_v1, %v342_v63  ;;  %v1743_v9 = vpack.c.bf16 %v169_v3, %v163_v2 }
  0x20   :  { %v168_v10 = vld [vmem:[%s4627_s1 + $0x450] sm:$0xff]  ;;  %v354_v11 = vld [vmem:[%s4627_s1 + $0xa20] sm:$0xff]  ;;  %v1807_v13 = vpack.c.bf16 %v361_v5, %v355_v4  ;;  %v175_v14 = vld [vmem:[%s4627_s1 + $0x488] sm:$0xff] }
  0x21   :  { %1730 = vmatpush1.bf16.msra.mxu1 %v1729_v34  ;;  %v360_v12 = vld [vmem:[%s4627_s1 + $0xa50] sm:$0xff]  ;;  %v181_v15 = vld [vmem:[%s4627_s1 + $0x4b8] sm:$0xff]  ;;  %v2792_v16 = vld [vmem:[%s4626_s0 + $0x8] sm:$0xff]  ;;  %v1745_v20 = vpack.c.bf16 %v168_v10, %v162_v7 }
  0x22   :  { %1794 = vmatpush1.bf16.msra.mxu0 %v1793_v35  ;;  %1732 = vmatprep.subr.bf16.mxu1 %v1731_v36  ;;  %v367_v17 = vld [vmem:[%s4627_s1 + $0xa88] sm:$0xff]  ;;  %v373_v18 = vld [vmem:[%s4627_s1 + $0xab8] sm:$0xff]  ;;  %v1809_v21 = vpack.c.bf16 %v360_v12, %v354_v11  ;;  %v1747_v22 = vpack.c.bf16 %v181_v15, %v175_v14  ;;  %v174_v23 = vld [vmem:[%s4627_s1 + $0x480] sm:$0xff] }
  0x23   :  { %1796 = vmatprep.subr.bf16.mxu0 %v1795_v40  ;;  %702 = vmatprep.mubr.f32.mxu1 %v2792_v16  ;;  %v2804_v19 = vld [vmem:[%s4626_s0 + $0x18] sm:$0xff]  ;;  %v180_v24 = vld [vmem:[%s4627_s1 + $0x4b0] sm:$0xff]  ;;  %v366_v25 = vld [vmem:[%s4627_s1 + $0xa80] sm:$0xff]  ;;  %v1811_v26 = vpack.c.bf16 %v373_v18, %v367_v17 }
  0x24   :  { %773 = vmatprep.mubr.f32.mxu0 %v2804_v19  ;;  %v372_v27 = vld [vmem:[%s4627_s1 + $0xab0] sm:$0xff]  ;;  %v187_v28 = vld [vmem:[%s4627_s1 + $0x4e8] sm:$0xff]  ;;  %v193_v29 = vld [vmem:[%s4627_s1 + $0x518] sm:$0xff]  ;;  %v1749_v32 = vpack.c.bf16 %v180_v24, %v174_v23 }
  0x25   :  { %1734 = vmatpush1.bf16.msra.mxu1 %v1733_v46  ;;  %v379_v30 = vld [vmem:[%s4627_s1 + $0xae8] sm:$0xff]  ;;  %v385_v31 = vld [vmem:[%s4627_s1 + $0xb18] sm:$0xff]  ;;  %v1813_v33 = vpack.c.bf16 %v372_v27, %v366_v25  ;;  %v1751_v34 = vpack.c.bf16 %v193_v29, %v187_v28  ;;  %v186_v35 = vld [vmem:[%s4627_s1 + $0x4e0] sm:$0xff] }
  0x26   :  { %1798 = vmatpush1.bf16.msra.mxu0 %v1797_v47  ;;  %1736 = vmatprep.subr.bf16.mxu1 %v1735_v48  ;;  %v192_v36 = vld [vmem:[%s4627_s1 + $0x510] sm:$0xff]  ;;  %v378_v37 = vld [vmem:[%s4627_s1 + $0xae0] sm:$0xff]  ;;  %v1815_v38 = vpack.c.bf16 %v385_v31, %v379_v30  ;;  %v199_v40 = vld [vmem:[%s4627_s1 + $0x548] sm:$0xff] }
  0x27   :  { %1800 = vmatprep.subr.bf16.mxu0 %v1799_v52  ;;  %v384_v39 = vld [vmem:[%s4627_s1 + $0xb10] sm:$0xff]  ;;  %v205_v41 = vld [vmem:[%s4627_s1 + $0x578] sm:$0xff]  ;;  %v391_v42 = vld [vmem:[%s4627_s1 + $0xb48] sm:$0xff]  ;;  %v1753_v44 = vpack.c.bf16 %v192_v36, %v186_v35 }
  0x28   :  { %v397_v43 = vld [vmem:[%s4627_s1 + $0xb78] sm:$0xff]  ;;  %v1817_v45 = vpack.c.bf16 %v384_v39, %v378_v37  ;;  %v1755_v46 = vpack.c.bf16 %v205_v41, %v199_v40  ;;  %v198_v47 = vld [vmem:[%s4627_s1 + $0x540] sm:$0xff]  ;;  %v204_v48 = vld [vmem:[%s4627_s1 + $0x570] sm:$0xff] }
  0x29   :  { %1738 = vmatpush1.bf16.msra.mxu1 %v1737_v58  ;;  %v390_v49 = vld [vmem:[%s4627_s1 + $0xb40] sm:$0xff]  ;;  %v1819_v50 = vpack.c.bf16 %v397_v43, %v391_v42  ;;  %v396_v51 = vld [vmem:[%s4627_s1 + $0xb70] sm:$0xff]  ;;  %v211_v52 = vld [vmem:[%s4627_s1 + $0x5a8] sm:$0xff]  ;;  %v1757_v56 = vpack.c.bf16 %v204_v48, %v198_v47 }
  0x2a   :  { %1802 = vmatpush1.bf16.msra.mxu0 %v1801_v59  ;;  %1740 = vmatprep.subr.bf16.mxu1 %v1739_v60  ;;  %v217_v53 = vld [vmem:[%s4627_s1 + $0x5d8] sm:$0xff]  ;;  %v403_v54 = vld [vmem:[%s4627_s1 + $0xba8] sm:$0xff]  ;;  %v1821_v57 = vpack.c.bf16 %v396_v51, %v390_v49  ;;  %v210_v59 = vld [vmem:[%s4627_s1 + $0x5a0] sm:$0xff] }
  0x2b   :  { %1804 = vmatprep.subr.bf16.mxu0 %v1803_v0  ;;  %v409_v55 = vld [vmem:[%s4627_s1 + $0xbd8] sm:$0xff]  ;;  %v1759_v58 = vpack.c.bf16 %v217_v53, %v211_v52  ;;  %v216_v60 = vld [vmem:[%s4627_s1 + $0x5d0] sm:$0xff]  ;;  %v402_v61 = vld [vmem:[%s4627_s1 + $0xba0] sm:$0xff] }
  0x2c   :  { %v1823_v62 = vpack.c.bf16 %v409_v55, %v403_v54  ;;  %v408_v63 = vld [vmem:[%s4627_s1 + $0xbd0] sm:$0xff]  ;;  %v33_v0 = vld [vmem:[%s4627_s1 + $0x18] sm:$0xff]  ;;  %v39_v1 = vld [vmem:[%s4627_s1 + $0x48] sm:$0xff]  ;;  %v1761_v4 = vpack.c.bf16 %v216_v60, %v210_v59 }
  0x2d   :  { %1742 = vmatpush1.bf16.msra.mxu1 %v1741_v6  ;;  %v415_v2 = vld [vmem:[%s4627_s1 + $0xc08] sm:$0xff]  ;;  %v421_v3 = vld [vmem:[%s4627_s1 + $0xc38] sm:$0xff]  ;;  %v1825_v5 = vpack.c.bf16 %v408_v63, %v402_v61  ;;  %v1891_v6 = vpack.c.bf16 %v39_v1, %v33_v0  ;;  %v414_v7 = vld [vmem:[%s4627_s1 + $0xc00] sm:$0xff] }
  0x2e   :  { %1806 = vmatpush1.bf16.msra.mxu0 %v1805_v8  ;;  %1744 = vmatprep.subr.bf16.mxu1 %v1743_v9  ;;  %v32_v8 = vld [vmem:[%s4627_s1 + $0x10] sm:$0xff]  ;;  %v38_v9 = vld [vmem:[%s4627_s1 + $0x40] sm:$0xff]  ;;  %v1827_v10 = vpack.c.bf16 %v421_v3, %v415_v2  ;;  %v45_v12 = vld [vmem:[%s4627_s1 + $0x78] sm:$0xff] }
  0x2f   :  { %1808 = vmatprep.subr.bf16.mxu0 %v1807_v13  ;;  %v420_v11 = vld [vmem:[%s4627_s1 + $0xc30] sm:$0xff]  ;;  %v51_v13 = vld [vmem:[%s4627_s1 + $0xa8] sm:$0xff]  ;;  %v433_v15 = vld [vmem:[%s4627_s1 + $0xc98] sm:$0xff] }
  0x30   :  { %v427_v14 = vld [vmem:[%s4627_s1 + $0xc68] sm:$0xff]  ;;  %v2930_v17 = vld [vmem:[%s4626_s0] sm:$0xff]  ;;  %v26_v18 = vld [vmem:[%s4626_s0 + $0x10] sm:$0xff] }
  0x31   :  { %1746 = vmatpush1.bf16.msra.mxu1 %v1745_v20  ;;  %v1893_v20 = vpack.c.bf16 %v38_v9, %v32_v8  ;;  %v426_v23 = vld [vmem:[%s4627_s1 + $0xc60] sm:$0xff]  ;;  %v44_v24 = vld [vmem:[%s4627_s1 + $0x70] sm:$0xff]  ;;  %v57_v28 = vld [vmem:[%s4627_s1 + $0xd8] sm:$0xff] }
  0x32   :  { %1810 = vmatpush1.bf16.msra.mxu0 %v1809_v21  ;;  %1748 = vmatprep.subr.bf16.mxu1 %v1747_v22  ;;  %v1829_v21 = vpack.c.bf16 %v420_v11, %v414_v7  ;;  %v1895_v22 = vpack.c.bf16 %v51_v13, %v45_v12  ;;  %v50_v25 = vld [vmem:[%s4627_s1 + $0xa0] sm:$0xff]  ;;  %v432_v27 = vld [vmem:[%s4627_s1 + $0xc90] sm:$0xff]  ;;  %v63_v29 = vld [vmem:[%s4627_s1 + $0x108] sm:$0xff] }
  0x33   :  { %1812 = vmatprep.subr.bf16.mxu0 %v1811_v26  ;;  %v1831_v26 = vpack.c.bf16 %v433_v15, %v427_v14  ;;  %v439_v30 = vld [vmem:[%s4627_s1 + $0xcc8] sm:$0xff]  ;;  %v445_v31 = vld [vmem:[%s4627_s1 + $0xcf8] sm:$0xff]  ;;  %v438_v35 = vld [vmem:[%s4627_s1 + $0xcc0] sm:$0xff] }
  0x34   :  { %v56_v36 = vld [vmem:[%s4627_s1 + $0xd0] sm:$0xff]  ;;  %v62_v37 = vld [vmem:[%s4627_s1 + $0x100] sm:$0xff]  ;;  %v69_v40 = vld [vmem:[%s4627_s1 + $0x138] sm:$0xff] }
  0x35   :  { %1750 = vmatpush1.bf16.msra.mxu1 %v1749_v32  ;;  %v1897_v32 = vpack.c.bf16 %v50_v25, %v44_v24  ;;  %v444_v39 = vld [vmem:[%s4627_s1 + $0xcf0] sm:$0xff]  ;;  %v75_v41 = vld [vmem:[%s4627_s1 + $0x168] sm:$0xff]  ;;  %v457_v43 = vld [vmem:[%s4627_s1 + $0xd58] sm:$0xff] }
  0x36   :  { %1814 = vmatpush1.bf16.msra.mxu0 %v1813_v33  ;;  %1752 = vmatprep.subr.bf16.mxu1 %v1751_v34  ;;  %v1833_v33 = vpack.c.bf16 %v432_v27, %v426_v23  ;;  %v1899_v34 = vpack.c.bf16 %v63_v29, %v57_v28  ;;  %v451_v42 = vld [vmem:[%s4627_s1 + $0xd28] sm:$0xff]  ;;  %v450_v47 = vld [vmem:[%s4627_s1 + $0xd20] sm:$0xff]  ;;  %v68_v48 = vld [vmem:[%s4627_s1 + $0x130] sm:$0xff] }
  0x37   :  { %1816 = vmatprep.subr.bf16.mxu0 %v1815_v38  ;;  %v1835_v38 = vpack.c.bf16 %v445_v31, %v439_v30  ;;  %v74_v49 = vld [vmem:[%s4627_s1 + $0x160] sm:$0xff]  ;;  %v456_v51 = vld [vmem:[%s4627_s1 + $0xd50] sm:$0xff]  ;;  %v81_v52 = vld [vmem:[%s4627_s1 + $0x198] sm:$0xff] }
  0x38   :  { %v87_v53 = vld [vmem:[%s4627_s1 + $0x1c8] sm:$0xff]  ;;  %v469_v55 = vld [vmem:[%s4627_s1 + $0xdb8] sm:$0xff]  ;;  %v462_v59 = vld [vmem:[%s4627_s1 + $0xd80] sm:$0xff] }
  0x39   :  { %1754 = vmatpush1.bf16.msra.mxu1 %v1753_v44  ;;  %v1901_v44 = vpack.c.bf16 %v62_v37, %v56_v36  ;;  %v463_v54 = vld [vmem:[%s4627_s1 + $0xd88] sm:$0xff]  ;;  %v80_v60 = vld [vmem:[%s4627_s1 + $0x190] sm:$0xff]  ;;  %v86_v61 = vld [vmem:[%s4627_s1 + $0x1c0] sm:$0xff] }
  0x3a   :  { %1818 = vmatpush1.bf16.msra.mxu0 %v1817_v45  ;;  %1756 = vmatprep.subr.bf16.mxu1 %v1755_v46  ;;  %v1837_v45 = vpack.c.bf16 %v444_v39, %v438_v35  ;;  %v1903_v46 = vpack.c.bf16 %v75_v41, %v69_v40  ;;  %v468_v63 = vld [vmem:[%s4627_s1 + $0xdb0] sm:$0xff]  ;;  %v93_v0 = vld [vmem:[%s4627_s1 + $0x1f8] sm:$0xff]  ;;  %v99_v1 = vld [vmem:[%s4627_s1 + $0x228] sm:$0xff] }
  0x3b   :  { %1820 = vmatprep.subr.bf16.mxu0 %v1819_v50  ;;  %v1839_v50 = vpack.c.bf16 %v457_v43, %v451_v42  ;;  %v475_v2 = vld [vmem:[%s4627_s1 + $0xde8] sm:$0xff]  ;;  %v481_v3 = vld [vmem:[%s4627_s1 + $0xe18] sm:$0xff]  ;;  %v474_v7 = vld [vmem:[%s4627_s1 + $0xde0] sm:$0xff] }
  0x3c   :  { %v92_v8 = vld [vmem:[%s4627_s1 + $0x1f0] sm:$0xff]  ;;  %v98_v9 = vld [vmem:[%s4627_s1 + $0x220] sm:$0xff]  ;;  %v105_v12 = vld [vmem:[%s4627_s1 + $0x258] sm:$0xff] }
  0x3d   :  { %1758 = vmatpush1.bf16.msra.mxu1 %v1757_v56  ;;  %v1905_v56 = vpack.c.bf16 %v74_v49, %v68_v48  ;;  %v480_v11 = vld [vmem:[%s4627_s1 + $0xe10] sm:$0xff]  ;;  %v111_v13 = vld [vmem:[%s4627_s1 + $0x288] sm:$0xff]  ;;  %v493_v15 = vld [vmem:[%s4627_s1 + $0xe78] sm:$0xff] }
  0x3e   :  { %1822 = vmatpush1.bf16.msra.mxu0 %v1821_v57  ;;  %1760 = vmatprep.subr.bf16.mxu1 %v1759_v58  ;;  %v1841_v57 = vpack.c.bf16 %v456_v51, %v450_v47  ;;  %v1907_v58 = vpack.c.bf16 %v87_v53, %v81_v52  ;;  %v487_v14 = vld [vmem:[%s4627_s1 + $0xe48] sm:$0xff]  ;;  %v492_v23 = vld [vmem:[%s4627_s1 + $0xe70] sm:$0xff]  ;;  %v110_v25 = vld [vmem:[%s4627_s1 + $0x280] sm:$0xff] }
  0x3f   :  { %1824 = vmatprep.subr.bf16.mxu0 %v1823_v62  ;;  %v1843_v62 = vpack.c.bf16 %v469_v55, %v463_v54  ;;  %v104_v24 = vld [vmem:[%s4627_s1 + $0x250] sm:$0xff]  ;;  %v117_v27 = vld [vmem:[%s4627_s1 + $0x2b8] sm:$0xff]  ;;  %v123_v28 = vld [vmem:[%s4627_s1 + $0x2e8] sm:$0xff] }
  0x40   :  { %v3078_v29 = vld [vmem:[%s4626_s0 + $0x28] sm:$0xff]  ;;  %v505_v31 = vld [vmem:[%s4627_s1 + $0xed8] sm:$0xff]  ;;  %v498_v35 = vld [vmem:[%s4627_s1 + $0xea0] sm:$0xff] }
  0x41   :  { %1762 = vmatpush1.bf16.msra.mxu1 %v1761_v4  ;;  %v1909_v4 = vpack.c.bf16 %v86_v61, %v80_v60  ;;  %v499_v30 = vld [vmem:[%s4627_s1 + $0xea8] sm:$0xff]  ;;  %v116_v36 = vld [vmem:[%s4627_s1 + $0x2b0] sm:$0xff]  ;;  %v122_v37 = vld [vmem:[%s4627_s1 + $0x2e0] sm:$0xff] }
  0x42   :  { %1826 = vmatpush1.bf16.msra.mxu0 %v1825_v5  ;;  %1892 = vmatprep.subr.bf16.mxu1 %v1891_v6  ;;  %v1845_v5 = vpack.c.bf16 %v468_v63, %v462_v59  ;;  %v1911_v6 = vpack.c.bf16 %v99_v1, %v93_v0  ;;  %v504_v39 = vld [vmem:[%s4627_s1 + $0xed0] sm:$0xff]  ;;  %v129_v40 = vld [vmem:[%s4627_s1 + $0x318] sm:$0xff]  ;;  %v135_v41 = vld [vmem:[%s4627_s1 + $0x348] sm:$0xff] }
  0x43   :  { %1828 = vmatprep.subr.bf16.mxu0 %v1827_v10  ;;  %v1847_v10 = vpack.c.bf16 %v481_v3, %v475_v2  ;;  %v511_v42 = vld [vmem:[%s4627_s1 + $0xf08] sm:$0xff]  ;;  %v517_v43 = vld [vmem:[%s4627_s1 + $0xf38] sm:$0xff]  ;;  %v510_v47 = vld [vmem:[%s4627_s1 + $0xf00] sm:$0xff] }
  0x44   :  { %703 = vmatmul.mubr.f32.vlgmr.msra.gmra.mrb[0].mxu1 %v2930_v17  ;;  %v128_v48 = vld [vmem:[%s4627_s1 + $0x310] sm:$0xff]  ;;  %v134_v49 = vld [vmem:[%s4627_s1 + $0x340] sm:$0xff]  ;;  %v141_v52 = vld [vmem:[%s4627_s1 + $0x378] sm:$0xff] }
  0x45   :  { %774 = vmatmul.mubr.f32.vlgmr.msra.gmra.mrb[0].mxu0 %v26_v18  ;;  %1894 = vmatpush1.bf16.msra.mxu1 %v1893_v20  ;;  %v1913_v18 = vpack.c.bf16 %v98_v9, %v92_v8  ;;  %v486_v20 = vld [vmem:[%s4627_s1 + $0xe40] sm:$0xff]  ;;  %v516_v51 = vld [vmem:[%s4627_s1 + $0xf30] sm:$0xff]  ;;  %v147_v53 = vld [vmem:[%s4627_s1 + $0x3a8] sm:$0xff] }
  0x46   :  { %1830 = vmatpush1.bf16.msra.mxu0 %v1829_v21  ;;  %1896 = vmatprep.subr.bf16.mxu1 %v1895_v22  ;;  %v1849_v21 = vpack.c.bf16 %v480_v11, %v474_v7  ;;  %v1915_v22 = vpack.c.bf16 %v111_v13, %v105_v12  ;;  %v523_v54 = vld [vmem:[%s4627_s1 + $0xf68] sm:$0xff]  ;;  %v529_v55 = vld [vmem:[%s4627_s1 + $0xf98] sm:$0xff]  ;;  %v522_v59 = vld [vmem:[%s4627_s1 + $0xf60] sm:$0xff] }
  0x47   :  { %1832 = vmatprep.subr.bf16.mxu0 %v1831_v26  ;;  %915 = vmatprep.mubr.f32.mxu1 %v2792_v16  ;;  %v1851_v26 = vpack.c.bf16 %v493_v15, %v487_v14  ;;  %v140_v60 = vld [vmem:[%s4627_s1 + $0x370] sm:$0xff]  ;;  %v146_v61 = vld [vmem:[%s4627_s1 + $0x3a0] sm:$0xff]  ;;  %v153_v0 = vld [vmem:[%s4627_s1 + $0x3d8] sm:$0xff] }
  0x48   :  { %844 = vmatprep.mubr.f32.mxu0 %v3078_v29  ;;  %v528_v63 = vld [vmem:[%s4627_s1 + $0xf90] sm:$0xff]  ;;  %v159_v1 = vld [vmem:[%s4627_s1 + $0x408] sm:$0xff]  ;;  %v541_v3 = vld [vmem:[%s4627_s1 + $0xff8] sm:$0xff] }
  0x49   :  { %1898 = vmatpush1.bf16.msra.mxu1 %v1897_v32  ;;  %v1917_v32 = vpack.c.bf16 %v110_v25, %v104_v24  ;;  %v535_v2 = vld [vmem:[%s4627_s1 + $0xfc8] sm:$0xff]  ;;  %v534_v7 = vld [vmem:[%s4627_s1 + $0xfc0] sm:$0xff]  ;;  %v152_v8 = vld [vmem:[%s4627_s1 + $0x3d0] sm:$0xff] }
  0x4a   :  { %1834 = vmatpush1.bf16.msra.mxu0 %v1833_v33  ;;  %1900 = vmatprep.subr.bf16.mxu1 %v1899_v34  ;;  %v1853_v33 = vpack.c.bf16 %v492_v23, %v486_v20  ;;  %v1919_v34 = vpack.c.bf16 %v123_v28, %v117_v27  ;;  %v158_v9 = vld [vmem:[%s4627_s1 + $0x400] sm:$0xff]  ;;  %v540_v11 = vld [vmem:[%s4627_s1 + $0xff0] sm:$0xff]  ;;  %v165_v12 = vld [vmem:[%s4627_s1 + $0x438] sm:$0xff] }
  0x4b   :  { %1836 = vmatprep.subr.bf16.mxu0 %v1835_v38  ;;  %v1855_v38 = vpack.c.bf16 %v505_v31, %v499_v30  ;;  %v171_v13 = vld [vmem:[%s4627_s1 + $0x468] sm:$0xff]  ;;  %v553_v15 = vld [vmem:[%s4627_s1 + $0x1058] sm:$0xff]  ;;  %v1869_v20 = vpack.c.bf16 %v540_v11, %v534_v7  ;;  %v164_v23 = vld [vmem:[%s4627_s1 + $0x430] sm:$0xff] }
  0x4c   :  { %v547_v14 = vld [vmem:[%s4627_s1 + $0x1028] sm:$0xff]  ;;  %v170_v24 = vld [vmem:[%s4627_s1 + $0x460] sm:$0xff]  ;;  %v177_v27 = vld [vmem:[%s4627_s1 + $0x498] sm:$0xff] }
  0x4d   :  { %1902 = vmatpush1.bf16.msra.mxu1 %v1901_v44  ;;  %v1921_v44 = vpack.c.bf16 %v122_v37, %v116_v36  ;;  %v1871_v25 = vpack.c.bf16 %v553_v15, %v547_v14  ;;  %v183_v28 = vld [vmem:[%s4627_s1 + $0x4c8] sm:$0xff]  ;;  %v565_v31 = vld [vmem:[%s4627_s1 + $0x10b8] sm:$0xff]  ;;  %v176_v36 = vld [vmem:[%s4627_s1 + $0x490] sm:$0xff] }
  0x4e   :  { %1838 = vmatpush1.bf16.msra.mxu0 %v1837_v45  ;;  %1904 = vmatprep.subr.bf16.mxu1 %v1903_v46  ;;  %v1857_v45 = vpack.c.bf16 %v504_v39, %v498_v35  ;;  %v1923_v46 = vpack.c.bf16 %v135_v41, %v129_v40  ;;  %v559_v30 = vld [vmem:[%s4627_s1 + $0x1088] sm:$0xff]  ;;  %v558_v35 = vld [vmem:[%s4627_s1 + $0x1080] sm:$0xff]  ;;  %v564_v39 = vld [vmem:[%s4627_s1 + $0x10b0] sm:$0xff] }
  0x4f   :  { %1840 = vmatprep.subr.bf16.mxu0 %v1839_v50  ;;  %v1859_v50 = vpack.c.bf16 %v517_v43, %v511_v42  ;;  %v182_v37 = vld [vmem:[%s4627_s1 + $0x4c0] sm:$0xff]  ;;  %v189_v40 = vld [vmem:[%s4627_s1 + $0x4f8] sm:$0xff]  ;;  %v195_v41 = vld [vmem:[%s4627_s1 + $0x528] sm:$0xff] }
  0x50   :  { %v571_v42 = vld [vmem:[%s4627_s1 + $0x10e8] sm:$0xff]  ;;  %v577_v43 = vld [vmem:[%s4627_s1 + $0x1118] sm:$0xff]  ;;  %v594_v7 = vld [vmem:[%s4627_s1 + $0x11a0] sm:$0xff] }
  0x51   :  { %1906 = vmatpush1.bf16.msra.mxu1 %v1905_v56  ;;  %v1925_v56 = vpack.c.bf16 %v134_v49, %v128_v48  ;;  %v188_v48 = vld [vmem:[%s4627_s1 + $0x4f0] sm:$0xff]  ;;  %v194_v49 = vld [vmem:[%s4627_s1 + $0x520] sm:$0xff]  ;;  %v35_v14 = vld [vmem:[%s4627_s1 + $0x28] sm:$0xff] }
  0x52   :  { %1842 = vmatpush1.bf16.msra.mxu0 %v1841_v57  ;;  %1908 = vmatprep.subr.bf16.mxu1 %v1907_v58  ;;  %v1861_v57 = vpack.c.bf16 %v516_v51, %v510_v47  ;;  %v1927_v58 = vpack.c.bf16 %v147_v53, %v141_v52  ;;  %v570_v47 = vld [vmem:[%s4627_s1 + $0x10e0] sm:$0xff]  ;;  %v576_v51 = vld [vmem:[%s4627_s1 + $0x1110] sm:$0xff]  ;;  %v201_v52 = vld [vmem:[%s4627_s1 + $0x558] sm:$0xff] }
  0x53   :  { %1844 = vmatprep.subr.bf16.mxu0 %v1843_v62  ;;  %v1863_v62 = vpack.c.bf16 %v529_v55, %v523_v54  ;;  %v207_v53 = vld [vmem:[%s4627_s1 + $0x588] sm:$0xff]  ;;  %v589_v55 = vld [vmem:[%s4627_s1 + $0x1178] sm:$0xff]  ;;  %v600_v11 = vld [vmem:[%s4627_s1 + $0x11d0] sm:$0xff] }
  0x54   :  { %v583_v54 = vld [vmem:[%s4627_s1 + $0x1148] sm:$0xff]  ;;  %v41_v15 = vld [vmem:[%s4627_s1 + $0x58] sm:$0xff] }
  0x55   :  { %1910 = vmatpush1.bf16.msra.mxu1 %v1909_v4  ;;  %v1929_v4 = vpack.c.bf16 %v146_v61, %v140_v60  ;;  %v200_v60 = vld [vmem:[%s4627_s1 + $0x550] sm:$0xff]  ;;  %v206_v61 = vld [vmem:[%s4627_s1 + $0x580] sm:$0xff] }
  0x56   :  { %1846 = vmatpush1.bf16.msra.mxu0 %v1845_v5  ;;  %1912 = vmatprep.subr.bf16.mxu1 %v1911_v6  ;;  %v1865_v5 = vpack.c.bf16 %v528_v63, %v522_v59  ;;  %v1931_v6 = vpack.c.bf16 %v159_v1, %v153_v0  ;;  %v582_v59 = vld [vmem:[%s4627_s1 + $0x1140] sm:$0xff]  ;;  %v588_v63 = vld [vmem:[%s4627_s1 + $0x1170] sm:$0xff]  ;;  %v213_v0 = vld [vmem:[%s4627_s1 + $0x5b8] sm:$0xff] }
  0x57   :  { %1848 = vmatprep.subr.bf16.mxu0 %v1847_v10  ;;  %v1867_v10 = vpack.c.bf16 %v541_v3, %v535_v2  ;;  %v219_v1 = vld [vmem:[%s4627_s1 + $0x5e8] sm:$0xff]  ;;  %v601_v3 = vld [vmem:[%s4627_s1 + $0x11d8] sm:$0xff] }
  0x58   :  { %v595_v2 = vld [vmem:[%s4627_s1 + $0x11a8] sm:$0xff] }
  0x59   :  { %1914 = vmatpush1.bf16.msra.mxu1 %v1913_v18  ;;  %v1933_v18 = vpack.c.bf16 %v158_v9, %v152_v8  ;;  %v212_v8 = vld [vmem:[%s4627_s1 + $0x5b0] sm:$0xff]  ;;  %v218_v9 = vld [vmem:[%s4627_s1 + $0x5e0] sm:$0xff] }
  0x5a   :  { %1850 = vmatpush1.bf16.msra.mxu0 %v1849_v21  ;;  %1916 = vmatprep.subr.bf16.mxu1 %v1915_v22  ;;  %v1935_v21 = vpack.c.bf16 %v171_v13, %v165_v12  ;;  %v546_v22 = vld [vmem:[%s4627_s1 + $0x1020] sm:$0xff]  ;;  %v225_v12 = vld [vmem:[%s4627_s1 + $0x618] sm:$0xff]  ;;  %v231_v13 = vld [vmem:[%s4627_s1 + $0x648] sm:$0xff] }
  0x5b   :  { %1852 = vmatprep.subr.bf16.mxu0 %v1851_v26  ;;  %v552_v26 = vld [vmem:[%s4627_s1 + $0x1050] sm:$0xff] }
  0x5d   :  { %1918 = vmatpush1.bf16.msra.mxu1 %v1917_v32  ;;  %v1937_v32 = vpack.c.bf16 %v170_v24, %v164_v23  ;;  %v230_v23 = vld [vmem:[%s4627_s1 + $0x640] sm:$0xff] }
  0x5e   :  { %1854 = vmatpush1.bf16.msra.mxu0 %v1853_v33  ;;  %1920 = vmatprep.subr.bf16.mxu1 %v1919_v34  ;;  %v1873_v33 = vpack.c.bf16 %v552_v26, %v546_v22  ;;  %v1939_v34 = vpack.c.bf16 %v183_v28, %v177_v27  ;;  %v224_v22 = vld [vmem:[%s4627_s1 + $0x610] sm:$0xff]  ;;  %v34_v24 = vld [vmem:[%s4627_s1 + $0x20] sm:$0xff]  ;;  %v237_v27 = vld [vmem:[%s4627_s1 + $0x678] sm:$0xff] }
  0x5f   :  { %1856 = vmatprep.subr.bf16.mxu0 %v1855_v38  ;;  %v1875_v38 = vpack.c.bf16 %v565_v31, %v559_v30  ;;  %v40_v26 = vld [vmem:[%s4627_s1 + $0x50] sm:$0xff]  ;;  %v243_v28 = vld [vmem:[%s4627_s1 + $0x6a8] sm:$0xff]  ;;  %v53_v31 = vld [vmem:[%s4627_s1 + $0xb8] sm:$0xff] }
  0x60   :  { %v47_v30 = vld [vmem:[%s4627_s1 + $0x88] sm:$0xff] }
  0x61   :  { %1922 = vmatpush1.bf16.msra.mxu1 %v1921_v44  ;;  %v1941_v44 = vpack.c.bf16 %v182_v37, %v176_v36  ;;  %v236_v36 = vld [vmem:[%s4627_s1 + $0x670] sm:$0xff]  ;;  %v242_v37 = vld [vmem:[%s4627_s1 + $0x6a0] sm:$0xff] }
  0x62   :  { %1858 = vmatpush1.bf16.msra.mxu0 %v1857_v45  ;;  %1924 = vmatprep.subr.bf16.mxu1 %v1923_v46  ;;  %v1877_v45 = vpack.c.bf16 %v564_v39, %v558_v35  ;;  %v1943_v46 = vpack.c.bf16 %v195_v41, %v189_v40  ;;  %v1959_v35 = vpack.c.bf16 %v243_v28, %v237_v27  ;;  %v52_v40 = vld [vmem:[%s4627_s1 + $0xb0] sm:$0xff]  ;;  %v249_v41 = vld [vmem:[%s4627_s1 + $0x6d8] sm:$0xff]  ;;  %v107_v27 = vld [vmem:[%s4627_s1 + $0x268] sm:$0xff] }
  0x63   :  { %1860 = vmatprep.subr.bf16.mxu0 %v1859_v50  ;;  %v1879_v50 = vpack.c.bf16 %v577_v43, %v571_v42  ;;  %v2087_v39 = vpack.c.bf16 %v53_v31, %v47_v30  ;;  %v255_v42 = vld [vmem:[%s4627_s1 + $0x708] sm:$0xff]  ;;  %v113_v28 = vld [vmem:[%s4627_s1 + $0x298] sm:$0xff] }
  0x64   :  { %v59_v43 = vld [vmem:[%s4627_s1 + $0xe8] sm:$0xff] }
  0x65   :  { %1926 = vmatpush1.bf16.msra.mxu1 %v1925_v56  ;;  %v1945_v56 = vpack.c.bf16 %v194_v49, %v188_v48  ;;  %v248_v48 = vld [vmem:[%s4627_s1 + $0x6d0] sm:$0xff]  ;;  %v58_v49 = vld [vmem:[%s4627_s1 + $0xe0] sm:$0xff] }
  0x66   :  { %1862 = vmatpush1.bf16.msra.mxu0 %v1861_v57  ;;  %1928 = vmatprep.subr.bf16.mxu1 %v1927_v58  ;;  %v1881_v57 = vpack.c.bf16 %v576_v51, %v570_v47  ;;  %v1947_v58 = vpack.c.bf16 %v207_v53, %v201_v52  ;;  %v1963_v47 = vpack.c.bf16 %v255_v42, %v249_v41  ;;  %v64_v51 = vld [vmem:[%s4627_s1 + $0x110] sm:$0xff]  ;;  %v261_v52 = vld [vmem:[%s4627_s1 + $0x738] sm:$0xff]  ;;  %v267_v53 = vld [vmem:[%s4627_s1 + $0x768] sm:$0xff] }
  0x67   :  { %1864 = vmatprep.subr.bf16.mxu0 %v1863_v62  ;;  %v1883_v62 = vpack.c.bf16 %v589_v55, %v583_v54  ;;  %v71_v54 = vld [vmem:[%s4627_s1 + $0x148] sm:$0xff]  ;;  %v77_v55 = vld [vmem:[%s4627_s1 + $0x178] sm:$0xff] }
  0x68   :  { %v125_v41 = vld [vmem:[%s4627_s1 + $0x2f8] sm:$0xff] }
  0x69   :  { %1930 = vmatpush1.bf16.msra.mxu1 %v1929_v4  ;;  %v1949_v4 = vpack.c.bf16 %v206_v61, %v200_v60  ;;  %v70_v60 = vld [vmem:[%s4627_s1 + $0x140] sm:$0xff]  ;;  %v76_v61 = vld [vmem:[%s4627_s1 + $0x170] sm:$0xff] }
  0x6a   :  { %1866 = vmatpush1.bf16.msra.mxu0 %v1865_v5  ;;  %1932 = vmatprep.subr.bf16.mxu1 %v1931_v6  ;;  %v1885_v5 = vpack.c.bf16 %v588_v63, %v582_v59  ;;  %v1951_v6 = vpack.c.bf16 %v219_v1, %v213_v0  ;;  %v266_v59 = vld [vmem:[%s4627_s1 + $0x760] sm:$0xff]  ;;  %v279_v63 = vld [vmem:[%s4627_s1 + $0x7c8] sm:$0xff]  ;;  %v89_v1 = vld [vmem:[%s4627_s1 + $0x1d8] sm:$0xff] }
  0x6b   :  { %1868 = vmatprep.subr.bf16.mxu0 %v1867_v10  ;;  %v1887_v10 = vpack.c.bf16 %v601_v3, %v595_v2  ;;  %v83_v0 = vld [vmem:[%s4627_s1 + $0x1a8] sm:$0xff]  ;;  %v2097_v3 = vpack.c.bf16 %v76_v61, %v70_v60  ;;  %v333_v60 = vld [vmem:[%s4627_s1 + $0x978] sm:$0xff] }
  0x6c   :  { %v143_v61 = vld [vmem:[%s4627_s1 + $0x388] sm:$0xff] }
  0x6d   :  { %1934 = vmatpush1.bf16.msra.mxu1 %v1933_v18  ;;  %v1953_v18 = vpack.c.bf16 %v218_v9, %v212_v8  ;;  %v2099_v8 = vpack.c.bf16 %v89_v1, %v83_v0  ;;  %v88_v9 = vld [vmem:[%s4627_s1 + $0x1d0] sm:$0xff] }
  0x6e   :  { %1870 = vmatpush1.bf16.msra.mxu0 %v1869_v20  ;;  %1936 = vmatprep.subr.bf16.mxu1 %v1935_v21  ;;  %v1889_v20 = vpack.c.bf16 %v600_v11, %v594_v7  ;;  %v1955_v21 = vpack.c.bf16 %v231_v13, %v225_v12  ;;  %v82_v7 = vld [vmem:[%s4627_s1 + $0x1a0] sm:$0xff]  ;;  %v291_v11 = vld [vmem:[%s4627_s1 + $0x828] sm:$0xff]  ;;  %v101_v13 = vld [vmem:[%s4627_s1 + $0x238] sm:$0xff] }
  0x6f   :  { %1872 = vmatprep.subr.bf16.mxu0 %v1871_v25  ;;  %v2083_v25 = vpack.c.bf16 %v41_v15, %v35_v14  ;;  %v95_v12 = vld [vmem:[%s4627_s1 + $0x208] sm:$0xff]  ;;  %v2101_v15 = vpack.c.bf16 %v88_v9, %v82_v7  ;;  %v345_v7 = vld [vmem:[%s4627_s1 + $0x9d8] sm:$0xff] }
  0x70   :  { %v155_v9 = vld [vmem:[%s4627_s1 + $0x3e8] sm:$0xff] }
  0x71   :  { %1938 = vmatpush1.bf16.msra.mxu1 %v1937_v32  ;;  %v28_v32 = vld [vmem:[%s4626_s0 + $0x20] sm:$0xff] }
  0x72   :  { %1874 = vmatpush1.bf16.msra.mxu0 %v1873_v33  ;;  %1940 = vmatprep.subr.bf16.mxu1 %v1939_v34  ;;  %v1957_v33 = vpack.c.bf16 %v230_v23, %v224_v22  ;;  %v2085_v34 = vpack.c.bf16 %v40_v26, %v34_v24  ;;  %v94_v22 = vld [vmem:[%s4627_s1 + $0x200] sm:$0xff]  ;;  %v2103_v23 = vpack.c.bf16 %v101_v13, %v95_v12  ;;  %v100_v24 = vld [vmem:[%s4627_s1 + $0x230] sm:$0xff]  ;;  %v303_v26 = vld [vmem:[%s4627_s1 + $0x888] sm:$0xff] }
  0x73   :  { %1876 = vmatprep.subr.bf16.mxu0 %v1875_v38  ;;  %v46_v38 = vld [vmem:[%s4627_s1 + $0x80] sm:$0xff]  ;;  %v2105_v31 = vpack.c.bf16 %v100_v24, %v94_v22  ;;  %v357_v22 = vld [vmem:[%s4627_s1 + $0xa38] sm:$0xff]  ;;  %v167_v24 = vld [vmem:[%s4627_s1 + $0x448] sm:$0xff] }
  0x75   :  { %1942 = vmatpush1.bf16.msra.mxu1 %v1941_v44  ;;  %v65_v44 = vld [vmem:[%s4627_s1 + $0x118] sm:$0xff] }
  0x76   :  { %1878 = vmatpush1.bf16.msra.mxu0 %v1877_v45  ;;  %1944 = vmatprep.subr.bf16.mxu1 %v1943_v46  ;;  %v1961_v45 = vpack.c.bf16 %v242_v37, %v236_v36  ;;  %v2089_v46 = vpack.c.bf16 %v52_v40, %v46_v38  ;;  %v2107_v36 = vpack.c.bf16 %v113_v28, %v107_v27  ;;  %v112_v37 = vld [vmem:[%s4627_s1 + $0x290] sm:$0xff]  ;;  %v309_v38 = vld [vmem:[%s4627_s1 + $0x8b8] sm:$0xff]  ;;  %v119_v40 = vld [vmem:[%s4627_s1 + $0x2c8] sm:$0xff] }
  0x77   :  { %1880 = vmatprep.subr.bf16.mxu0 %v1879_v50  ;;  %v2091_v50 = vpack.c.bf16 %v65_v44, %v59_v43 }
  0x79   :  { %1946 = vmatpush1.bf16.msra.mxu1 %v1945_v56 }
  0x7a   :  { %1882 = vmatpush1.bf16.msra.mxu0 %v1881_v57  ;;  %1948 = vmatprep.subr.bf16.mxu1 %v1947_v58  ;;  %v2093_v57 = vpack.c.bf16 %v64_v51, %v58_v49  ;;  %v1967_v58 = vpack.c.bf16 %v267_v53, %v261_v52  ;;  %v321_v49 = vld [vmem:[%s4627_s1 + $0x918] sm:$0xff]  ;;  %v131_v51 = vld [vmem:[%s4627_s1 + $0x328] sm:$0xff] }
  0x7b   :  { %1884 = vmatprep.subr.bf16.mxu0 %v1883_v62  ;;  %v273_v62 = vld [vmem:[%s4627_s1 + $0x798] sm:$0xff] }
  0x7c   :  { %v137_v52 = vld [vmem:[%s4627_s1 + $0x358] sm:$0xff] }
  0x7d   :  { %1950 = vmatpush1.bf16.msra.mxu1 %v1949_v4  ;;  %v1971_v4 = vpack.c.bf16 %v279_v63, %v273_v62  ;;  %v149_v62 = vld [vmem:[%s4627_s1 + $0x3b8] sm:$0xff] }
  0x7e   :  { %1886 = vmatpush1.bf16.msra.mxu0 %v1885_v5  ;;  %1952 = vmatprep.subr.bf16.mxu1 %v1951_v6  ;;  %v272_v5 = vld [vmem:[%s4627_s1 + $0x790] sm:$0xff]  ;;  %v278_v6 = vld [vmem:[%s4627_s1 + $0x7c0] sm:$0xff] }
  0x7f   :  { %1888 = vmatprep.subr.bf16.mxu0 %v1887_v10  ;;  %v285_v10 = vld [vmem:[%s4627_s1 + $0x7f8] sm:$0xff]  ;;  %v1973_v14 = vpack.c.bf16 %v278_v6, %v272_v5  ;;  %v2119_v5 = vpack.c.bf16 %v149_v62, %v143_v61  ;;  %v148_v6 = vld [vmem:[%s4627_s1 + $0x3b0] sm:$0xff] }
  0x81   :  { %1954 = vmatpush1.bf16.msra.mxu1 %v1953_v18  ;;  %v1975_v18 = vpack.c.bf16 %v291_v11, %v285_v10  ;;  %v161_v10 = vld [vmem:[%s4627_s1 + $0x418] sm:$0xff] }
  0x82   :  { %1890 = vmatpush1.bf16.msra.mxu0 %v1889_v20  ;;  %1956 = vmatprep.subr.bf16.mxu1 %v1955_v21  ;;  %v284_v20 = vld [vmem:[%s4627_s1 + $0x7f0] sm:$0xff]  ;;  %v290_v21 = vld [vmem:[%s4627_s1 + $0x820] sm:$0xff] }
  0x83   :  { %2084 = vmatprep.subr.bf16.mxu0 %v2083_v25  ;;  %v297_v25 = vld [vmem:[%s4627_s1 + $0x858] sm:$0xff]  ;;  %v1977_v30 = vpack.c.bf16 %v290_v21, %v284_v20  ;;  %v2123_v20 = vpack.c.bf16 %v161_v10, %v155_v9  ;;  %v160_v21 = vld [vmem:[%s4627_s1 + $0x410] sm:$0xff] }
  0x84   :  { %916 = vmatmul.mubr.f32.vlgmr.msra.gmra.mrb[2].mxu1 %v2930_v17  ;;  %v254_v17 = vld [vmem:[%s4627_s1 + $0x700] sm:$0xff] }
  0x85   :  { %845 = vmatmul.mubr.f32.vlgmr.msra.gmra.mrb[0].mxu0 %v28_v32  ;;  %1958 = vmatpush1.bf16.msra.mxu1 %v1957_v33  ;;  %v1965_v56 = vpack.c.bf16 %v254_v17, %v248_v48  ;;  %v1979_v32 = vpack.c.bf16 %v303_v26, %v297_v25  ;;  %v296_v33 = vld [vmem:[%s4627_s1 + $0x850] sm:$0xff]  ;;  %v2111_v48 = vpack.c.bf16 %v125_v41, %v119_v40  ;;  %v173_v25 = vld [vmem:[%s4627_s1 + $0x478] sm:$0xff] }
  0x86   :  { %2086 = vmatpush1.bf16.msra.mxu0 %v2085_v34  ;;  %1960 = vmatprep.subr.bf16.mxu1 %v1959_v35  ;;  %v302_v34 = vld [vmem:[%s4627_s1 + $0x880] sm:$0xff]  ;;  %v124_v17 = vld [vmem:[%s4627_s1 + $0x2f0] sm:$0xff] }
  0x87   :  { %2088 = vmatprep.subr.bf16.mxu0 %v2087_v39  ;;  %986 = vmatprep.mubr.f32.mxu1 %v2804_v19  ;;  %v260_v19 = vld [vmem:[%s4627_s1 + $0x730] sm:$0xff]  ;;  %v106_v35 = vld [vmem:[%s4627_s1 + $0x260] sm:$0xff]  ;;  %v315_v39 = vld [vmem:[%s4627_s1 + $0x8e8] sm:$0xff]  ;;  %v1981_v42 = vpack.c.bf16 %v302_v34, %v296_v33  ;;  %v2127_v33 = vpack.c.bf16 %v173_v25, %v167_v24 }
  0x88   :  { %1128 = vmatprep.mubr.f32.mxu0 %v2792_v16  ;;  %v2095_v16 = vpack.c.bf16 %v77_v55, %v71_v54  ;;  %v1969_v2 = vpack.c.bf16 %v266_v59, %v260_v19  ;;  %v2109_v43 = vpack.c.bf16 %v112_v37, %v106_v35  ;;  %v1983_v44 = vpack.c.bf16 %v315_v39, %v309_v38  ;;  %v136_v59 = vld [vmem:[%s4627_s1 + $0x350] sm:$0xff]  ;;  %v369_v35 = vld [vmem:[%s4627_s1 + $0xa98] sm:$0xff]  ;;  %v179_v37 = vld [vmem:[%s4627_s1 + $0x4a8] sm:$0xff] }
  0x89   :  { %1962 = vmatpush1.bf16.msra.mxu1 %v1961_v45  ;;  %v308_v45 = vld [vmem:[%s4627_s1 + $0x8b0] sm:$0xff]  ;;  %v2115_v19 = vpack.c.bf16 %v137_v52, %v131_v51  ;;  %v185_v38 = vld [vmem:[%s4627_s1 + $0x4d8] sm:$0xff] }
  0x8a   :  { %2090 = vmatpush1.bf16.msra.mxu0 %v2089_v46  ;;  %1964 = vmatprep.subr.bf16.mxu1 %v1963_v47  ;;  %v314_v46 = vld [vmem:[%s4627_s1 + $0x8e0] sm:$0xff]  ;;  %v172_v34 = vld [vmem:[%s4627_s1 + $0x470] sm:$0xff] }
  0x8b   :  { %2092 = vmatprep.subr.bf16.mxu0 %v2091_v50  ;;  %v118_v47 = vld [vmem:[%s4627_s1 + $0x2c0] sm:$0xff]  ;;  %v327_v50 = vld [vmem:[%s4627_s1 + $0x948] sm:$0xff]  ;;  %v1985_v53 = vpack.c.bf16 %v314_v46, %v308_v45  ;;  %v2131_v45 = vpack.c.bf16 %v185_v38, %v179_v37  ;;  %v184_v46 = vld [vmem:[%s4627_s1 + $0x4d0] sm:$0xff] }
  0x8c   :  { %v2113_v54 = vpack.c.bf16 %v124_v17, %v118_v47  ;;  %v1987_v55 = vpack.c.bf16 %v327_v50, %v321_v49  ;;  %v381_v47 = vld [vmem:[%s4627_s1 + $0xaf8] sm:$0xff]  ;;  %v191_v17 = vld [vmem:[%s4627_s1 + $0x508] sm:$0xff] }
  0x8d   :  { %1966 = vmatpush1.bf16.msra.mxu1 %v1965_v56  ;;  %v320_v56 = vld [vmem:[%s4627_s1 + $0x910] sm:$0xff]  ;;  %v197_v49 = vld [vmem:[%s4627_s1 + $0x538] sm:$0xff] }
  0x8e   :  { %2094 = vmatpush1.bf16.msra.mxu0 %v2093_v57  ;;  %1968 = vmatprep.subr.bf16.mxu1 %v1967_v58  ;;  %v326_v57 = vld [vmem:[%s4627_s1 + $0x940] sm:$0xff] }
  0x8f   :  { %2096 = vmatprep.subr.bf16.mxu0 %v2095_v16  ;;  %v130_v58 = vld [vmem:[%s4627_s1 + $0x320] sm:$0xff]  ;;  %v339_v16 = vld [vmem:[%s4627_s1 + $0x9a8] sm:$0xff]  ;;  %v1989_v63 = vpack.c.bf16 %v326_v57, %v320_v56  ;;  %v2135_v56 = vpack.c.bf16 %v197_v49, %v191_v17  ;;  %v196_v57 = vld [vmem:[%s4627_s1 + $0x530] sm:$0xff] }
  0x90   :  { %v2117_v0 = vpack.c.bf16 %v136_v59, %v130_v58  ;;  %v1991_v1 = vpack.c.bf16 %v339_v16, %v333_v60  ;;  %v393_v58 = vld [vmem:[%s4627_s1 + $0xb58] sm:$0xff]  ;;  %v203_v59 = vld [vmem:[%s4627_s1 + $0x568] sm:$0xff] }
  0x91   :  { %1970 = vmatpush1.bf16.msra.mxu1 %v1969_v2  ;;  %v332_v2 = vld [vmem:[%s4627_s1 + $0x970] sm:$0xff]  ;;  %v209_v60 = vld [vmem:[%s4627_s1 + $0x598] sm:$0xff] }
  0x92   :  { %2098 = vmatpush1.bf16.msra.mxu0 %v2097_v3  ;;  %1972 = vmatprep.subr.bf16.mxu1 %v1971_v4  ;;  %v338_v3 = vld [vmem:[%s4627_s1 + $0x9a0] sm:$0xff] }
  0x93   :  { %2100 = vmatprep.subr.bf16.mxu0 %v2099_v8  ;;  %v142_v4 = vld [vmem:[%s4627_s1 + $0x380] sm:$0xff]  ;;  %v351_v8 = vld [vmem:[%s4627_s1 + $0xa08] sm:$0xff]  ;;  %v1993_v11 = vpack.c.bf16 %v338_v3, %v332_v2  ;;  %v2139_v2 = vpack.c.bf16 %v209_v60, %v203_v59  ;;  %v208_v3 = vld [vmem:[%s4627_s1 + $0x590] sm:$0xff] }
  0x94   :  { %v2121_v12 = vpack.c.bf16 %v148_v6, %v142_v4  ;;  %v1995_v13 = vpack.c.bf16 %v351_v8, %v345_v7  ;;  %v405_v4 = vld [vmem:[%s4627_s1 + $0xbb8] sm:$0xff]  ;;  %v215_v6 = vld [vmem:[%s4627_s1 + $0x5c8] sm:$0xff] }
  0x95   :  { %1974 = vmatpush1.bf16.msra.mxu1 %v1973_v14  ;;  %v344_v14 = vld [vmem:[%s4627_s1 + $0x9d0] sm:$0xff]  ;;  %v221_v7 = vld [vmem:[%s4627_s1 + $0x5f8] sm:$0xff] }
  0x96   :  { %2102 = vmatpush1.bf16.msra.mxu0 %v2101_v15  ;;  %1976 = vmatprep.subr.bf16.mxu1 %v1975_v18  ;;  %v350_v15 = vld [vmem:[%s4627_s1 + $0xa00] sm:$0xff] }
  0x97   :  { %2104 = vmatprep.subr.bf16.mxu0 %v2103_v23  ;;  %v154_v18 = vld [vmem:[%s4627_s1 + $0x3e0] sm:$0xff]  ;;  %v363_v23 = vld [vmem:[%s4627_s1 + $0xa68] sm:$0xff]  ;;  %v1997_v26 = vpack.c.bf16 %v350_v15, %v344_v14  ;;  %v2143_v14 = vpack.c.bf16 %v221_v7, %v215_v6  ;;  %v220_v15 = vld [vmem:[%s4627_s1 + $0x5f0] sm:$0xff] }
  0x98   :  { %v2125_v27 = vpack.c.bf16 %v160_v21, %v154_v18  ;;  %v1999_v28 = vpack.c.bf16 %v363_v23, %v357_v22  ;;  %v417_v18 = vld [vmem:[%s4627_s1 + $0xc18] sm:$0xff]  ;;  %v227_v21 = vld [vmem:[%s4627_s1 + $0x628] sm:$0xff] }
  0x99   :  { %1978 = vmatpush1.bf16.msra.mxu1 %v1977_v30  ;;  %v356_v30 = vld [vmem:[%s4627_s1 + $0xa30] sm:$0xff]  ;;  %v233_v22 = vld [vmem:[%s4627_s1 + $0x658] sm:$0xff] }
  0x9a   :  { %2106 = vmatpush1.bf16.msra.mxu0 %v2105_v31  ;;  %1980 = vmatprep.subr.bf16.mxu1 %v1979_v32  ;;  %v362_v31 = vld [vmem:[%s4627_s1 + $0xa60] sm:$0xff] }
  0x9b   :  { %2108 = vmatprep.subr.bf16.mxu0 %v2107_v36  ;;  %v166_v32 = vld [vmem:[%s4627_s1 + $0x440] sm:$0xff]  ;;  %v375_v36 = vld [vmem:[%s4627_s1 + $0xac8] sm:$0xff]  ;;  %v2001_v39 = vpack.c.bf16 %v362_v31, %v356_v30  ;;  %v2147_v30 = vpack.c.bf16 %v233_v22, %v227_v21  ;;  %v232_v31 = vld [vmem:[%s4627_s1 + $0x650] sm:$0xff] }
  0x9c   :  { %v2129_v40 = vpack.c.bf16 %v172_v34, %v166_v32  ;;  %v2003_v41 = vpack.c.bf16 %v375_v36, %v369_v35  ;;  %v429_v32 = vld [vmem:[%s4627_s1 + $0xc78] sm:$0xff]  ;;  %v239_v34 = vld [vmem:[%s4627_s1 + $0x688] sm:$0xff] }
  0x9d   :  { %1982 = vmatpush1.bf16.msra.mxu1 %v1981_v42  ;;  %v368_v42 = vld [vmem:[%s4627_s1 + $0xa90] sm:$0xff]  ;;  %v245_v35 = vld [vmem:[%s4627_s1 + $0x6b8] sm:$0xff] }
  0x9e   :  { %2110 = vmatpush1.bf16.msra.mxu0 %v2109_v43  ;;  %1984 = vmatprep.subr.bf16.mxu1 %v1983_v44  ;;  %v374_v43 = vld [vmem:[%s4627_s1 + $0xac0] sm:$0xff] }
  0x9f   :  { %2112 = vmatprep.subr.bf16.mxu0 %v2111_v48  ;;  %v178_v44 = vld [vmem:[%s4627_s1 + $0x4a0] sm:$0xff]  ;;  %v387_v48 = vld [vmem:[%s4627_s1 + $0xb28] sm:$0xff]  ;;  %v2005_v50 = vpack.c.bf16 %v374_v43, %v368_v42  ;;  %v2151_v42 = vpack.c.bf16 %v245_v35, %v239_v34  ;;  %v244_v43 = vld [vmem:[%s4627_s1 + $0x6b0] sm:$0xff] }
  0xa0   :  { %v2133_v51 = vpack.c.bf16 %v184_v46, %v178_v44  ;;  %v2007_v52 = vpack.c.bf16 %v387_v48, %v381_v47  ;;  %v441_v44 = vld [vmem:[%s4627_s1 + $0xcd8] sm:$0xff]  ;;  %v3738_v46 = vld [vmem:[%s4626_s0 + $0x10] sm:$0xff]  ;;  %v251_v47 = vld [vmem:[%s4627_s1 + $0x6e8] sm:$0xff] }
  0xa1   :  { %1986 = vmatpush1.bf16.msra.mxu1 %v1985_v53  ;;  %v380_v53 = vld [vmem:[%s4627_s1 + $0xaf0] sm:$0xff]  ;;  %v257_v48 = vld [vmem:[%s4627_s1 + $0x718] sm:$0xff] }
  0xa2   :  { %2114 = vmatpush1.bf16.msra.mxu0 %v2113_v54  ;;  %1988 = vmatprep.subr.bf16.mxu1 %v1987_v55  ;;  %v386_v54 = vld [vmem:[%s4627_s1 + $0xb20] sm:$0xff] }
  0xa3   :  { %2116 = vmatprep.subr.bf16.mxu0 %v2115_v19  ;;  %v190_v55 = vld [vmem:[%s4627_s1 + $0x500] sm:$0xff]  ;;  %v399_v19 = vld [vmem:[%s4627_s1 + $0xb88] sm:$0xff]  ;;  %v2009_v16 = vpack.c.bf16 %v386_v54, %v380_v53 }
  0xa4   :  { %v2137_v61 = vpack.c.bf16 %v196_v57, %v190_v55  ;;  %v2011_v62 = vpack.c.bf16 %v399_v19, %v393_v58 }
  0xa5   :  { %1990 = vmatpush1.bf16.msra.mxu1 %v1989_v63  ;;  %v392_v63 = vld [vmem:[%s4627_s1 + $0xb50] sm:$0xff] }
  0xa6   :  { %2118 = vmatpush1.bf16.msra.mxu0 %v2117_v0  ;;  %1992 = vmatprep.subr.bf16.mxu1 %v1991_v1  ;;  %v398_v0 = vld [vmem:[%s4627_s1 + $0xb80] sm:$0xff] }
  0xa7   :  { %2120 = vmatprep.subr.bf16.mxu0 %v2119_v5  ;;  %v202_v1 = vld [vmem:[%s4627_s1 + $0x560] sm:$0xff]  ;;  %v411_v5 = vld [vmem:[%s4627_s1 + $0xbe8] sm:$0xff]  ;;  %v2013_v8 = vpack.c.bf16 %v398_v0, %v392_v63 }
  0xa8   :  { %v2141_v9 = vpack.c.bf16 %v208_v3, %v202_v1  ;;  %v2015_v10 = vpack.c.bf16 %v411_v5, %v405_v4 }
  0xa9   :  { %1994 = vmatpush1.bf16.msra.mxu1 %v1993_v11  ;;  %v404_v11 = vld [vmem:[%s4627_s1 + $0xbb0] sm:$0xff] }
  0xaa   :  { %2122 = vmatpush1.bf16.msra.mxu0 %v2121_v12  ;;  %1996 = vmatprep.subr.bf16.mxu1 %v1995_v13  ;;  %v410_v12 = vld [vmem:[%s4627_s1 + $0xbe0] sm:$0xff] }
  0xab   :  { %2124 = vmatprep.subr.bf16.mxu0 %v2123_v20  ;;  %v214_v13 = vld [vmem:[%s4627_s1 + $0x5c0] sm:$0xff]  ;;  %v423_v20 = vld [vmem:[%s4627_s1 + $0xc48] sm:$0xff]  ;;  %v2017_v23 = vpack.c.bf16 %v410_v12, %v404_v11 }
  0xac   :  { %v2145_v24 = vpack.c.bf16 %v220_v15, %v214_v13  ;;  %v2019_v25 = vpack.c.bf16 %v423_v20, %v417_v18 }
  0xad   :  { %1998 = vmatpush1.bf16.msra.mxu1 %v1997_v26  ;;  %v416_v26 = vld [vmem:[%s4627_s1 + $0xc10] sm:$0xff] }
  0xae   :  { %2126 = vmatpush1.bf16.msra.mxu0 %v2125_v27  ;;  %2000 = vmatprep.subr.bf16.mxu1 %v1999_v28  ;;  %v422_v27 = vld [vmem:[%s4627_s1 + $0xc40] sm:$0xff] }
  0xaf   :  { %2128 = vmatprep.subr.bf16.mxu0 %v2127_v33  ;;  %v226_v28 = vld [vmem:[%s4627_s1 + $0x620] sm:$0xff]  ;;  %v435_v33 = vld [vmem:[%s4627_s1 + $0xca8] sm:$0xff]  ;;  %v2021_v36 = vpack.c.bf16 %v422_v27, %v416_v26 }
  0xb0   :  { %v2149_v37 = vpack.c.bf16 %v232_v31, %v226_v28  ;;  %v2023_v38 = vpack.c.bf16 %v435_v33, %v429_v32 }
  0xb1   :  { %2002 = vmatpush1.bf16.msra.mxu1 %v2001_v39  ;;  %v428_v39 = vld [vmem:[%s4627_s1 + $0xc70] sm:$0xff] }
  0xb2   :  { %2130 = vmatpush1.bf16.msra.mxu0 %v2129_v40  ;;  %2004 = vmatprep.subr.bf16.mxu1 %v2003_v41  ;;  %v434_v40 = vld [vmem:[%s4627_s1 + $0xca0] sm:$0xff] }
  0xb3   :  { %2132 = vmatprep.subr.bf16.mxu0 %v2131_v45  ;;  %v238_v41 = vld [vmem:[%s4627_s1 + $0x680] sm:$0xff]  ;;  %v447_v45 = vld [vmem:[%s4627_s1 + $0xd08] sm:$0xff] }
  0xb5   :  { %2006 = vmatpush1.bf16.msra.mxu1 %v2005_v50 }
  0xb6   :  { %2134 = vmatpush1.bf16.msra.mxu0 %v2133_v51  ;;  %2008 = vmatprep.subr.bf16.mxu1 %v2007_v52 }
  0xb7   :  { %2136 = vmatprep.subr.bf16.mxu0 %v2135_v56 }
  0xb9   :  { %2010 = vmatpush1.bf16.msra.mxu1 %v2009_v16 }
  0xba   :  { %2138 = vmatpush1.bf16.msra.mxu0 %v2137_v61  ;;  %2012 = vmatprep.subr.bf16.mxu1 %v2011_v62 }
  0xbb   :  { %2140 = vmatprep.subr.bf16.mxu0 %v2139_v2 }
  0xbd   :  { %2014 = vmatpush1.bf16.msra.mxu1 %v2013_v8 }
  0xbe   :  { %2142 = vmatpush1.bf16.msra.mxu0 %v2141_v9  ;;  %2016 = vmatprep.subr.bf16.mxu1 %v2015_v10 }
  0xbf   :  { %2144 = vmatprep.subr.bf16.mxu0 %v2143_v14 }
  0xc1   :  { %2018 = vmatpush1.bf16.msra.mxu1 %v2017_v23 }
  0xc2   :  { %2146 = vmatpush1.bf16.msra.mxu0 %v2145_v24  ;;  %2020 = vmatprep.subr.bf16.mxu1 %v2019_v25 }
  0xc3   :  { %2148 = vmatprep.subr.bf16.mxu0 %v2147_v30 }
  0xc4   :  { %987 = vmatmul.mubr.f32.vlgmr.msra.gmra.mrb[2].mxu1 %v3738_v46 }
  0xc5   :  { %13 = vsyncpa [#allocation5], 0  ;;  %2022 = vmatpush1.bf16.msra.mxu1 %v2021_v36  ;;  %v2404_v17 = vld [vmem:[%s4626_s0] sm:$0xff]  ;;  %v2025_v49 = vpack.c.bf16 %v434_v40, %v428_v39  ;;  %v2153_v50 = vpack.c.bf16 %v244_v43, %v238_v41  ;;  %v2027_v51 = vpack.c.bf16 %v447_v45, %v441_v44  ;;  %v440_v52 = vld [vmem:[%s4627_s1 + $0xcd0] sm:$0xff]  ;;  %v2155_v55 = vpack.c.bf16 %v257_v48, %v251_v47  ;;  %s2458_s19 = smov [#allocation2]  }
  0xc6   :  { %1129 = vmatmul.mubr.f32.vlgmr.msra.gmra.mrb[2].mxu0 %v2404_v17  ;;  %2024 = vmatprep.subr.bf16.mxu1 %v2023_v38  ;;  %v446_v53 = vld [vmem:[%s4627_s1 + $0xd00] sm:$0xff]  ;;  %v256_v56 = vld [vmem:[%s4627_s1 + $0x710] sm:$0xff]  ;;  %v453_v57 = vld [vmem:[%s4627_s1 + $0xd38] sm:$0xff]  ;;  %vm1282_vm0 = vcmask 850944   ;;  %s1605_s20 = sshll.u32 %s2458_s19, 4  ;;  %s1606_s20 = int_to_ptr.vmem [resolvable:$true] %s1605_s20 }
  0xc7   :  { %2150 = vmatpush1.bf16.msra.mxu0 %v2149_v37  ;;  %v250_v54 = vld [vmem:[%s4627_s1 + $0x6e0] sm:$0xff]  ;;  %v459_v58 = vld [vmem:[%s4627_s1 + $0xd68] sm:$0xff]  ;;  %1057 = vmatprep.mubr.f32.mxu1 %v3078_v29  ;;  %v269_v59 = vld [vmem:[%s4627_s1 + $0x778] sm:$0xff]  ;;  %v2029_v16 = vpack.c.bf16 %v446_v53, %v440_v52  ;;  %p2413_p1 = scmp.lt.s32.totalorder %s1606_s20, %s1606_s20 }
  0xc8   :  { %2152 = vmatprep.subr.bf16.mxu0 %v2151_v42  ;;  %v263_v19 = vld [vmem:[%s4627_s1 + $0x748] sm:$0xff]  ;;  %v2405_v60 = vld [vmem:[%s4626_s0 + $0x18] sm:$0xff]  ;;  %v2157_v61 = vpack.c.bf16 %v256_v56, %v250_v54  ;;  %v2031_v62 = vpack.c.bf16 %v459_v58, %v453_v57  ;;  %v452_v29 = vld [vmem:[%s4627_s1 + $0xd30] sm:$0xff] }
  0xc9   :  { %1199 = vmatprep.mubr.f32.mxu0 %v2405_v60  ;;  %2026 = vmatpush1.bf16.msra.mxu1 %v2025_v49  ;;  %v458_v63 = vld [vmem:[%s4627_s1 + $0xd60] sm:$0xff]  ;;  %v2159_v1 = vpack.c.bf16 %v269_v59, %v263_v19  ;;  %v268_v2 = vld [vmem:[%s4627_s1 + $0x770] sm:$0xff]  ;;  %v465_v3 = vld [vmem:[%s4627_s1 + $0xd98] sm:$0xff] }
  0xca   :  { %2028 = vmatprep.subr.bf16.mxu1 %v2027_v51  ;;  %v262_v0 = vld [vmem:[%s4627_s1 + $0x740] sm:$0xff]  ;;  %v471_v4 = vld [vmem:[%s4627_s1 + $0xdc8] sm:$0xff]  ;;  %v281_v6 = vld [vmem:[%s4627_s1 + $0x7d8] sm:$0xff]  ;;  %v2033_v7 = vpack.c.bf16 %v458_v63, %v452_v29 }
  0xcb   :  { %2154 = vmatpush1.bf16.msra.mxu0 %v2153_v50  ;;  %v275_v5 = vld [vmem:[%s4627_s1 + $0x7a8] sm:$0xff]  ;;  %v2161_v8 = vpack.c.bf16 %v268_v2, %v262_v0  ;;  %v2035_v9 = vpack.c.bf16 %v471_v4, %v465_v3  ;;  %v464_v10 = vld [vmem:[%s4627_s1 + $0xd90] sm:$0xff]  ;;  %v470_v11 = vld [vmem:[%s4627_s1 + $0xdc0] sm:$0xff] }
  0xcc   :  { %2156 = vmatprep.subr.bf16.mxu0 %v2155_v55  ;;  %v274_v12 = vld [vmem:[%s4627_s1 + $0x7a0] sm:$0xff]  ;;  %v2163_v13 = vpack.c.bf16 %v281_v6, %v275_v5  ;;  %v280_v14 = vld [vmem:[%s4627_s1 + $0x7d0] sm:$0xff]  ;;  %v477_v15 = vld [vmem:[%s4627_s1 + $0xdf8] sm:$0xff]  ;;  %v2037_v22 = vpack.c.bf16 %v470_v11, %v464_v10 }
  0xcd   :  { %2030 = vmatpush1.bf16.msra.mxu1 %v2029_v16  ;;  %v483_v18 = vld [vmem:[%s4627_s1 + $0xe28] sm:$0xff]  ;;  %v293_v21 = vld [vmem:[%s4627_s1 + $0x838] sm:$0xff]  ;;  %v2165_v23 = vpack.c.bf16 %v280_v14, %v274_v12  ;;  %v476_v25 = vld [vmem:[%s4627_s1 + $0xdf0] sm:$0xff] }
  0xce   :  { %2032 = vmatprep.subr.bf16.mxu1 %v2031_v62  ;;  %v287_v20 = vld [vmem:[%s4627_s1 + $0x808] sm:$0xff]  ;;  %v2039_v24 = vpack.c.bf16 %v483_v18, %v477_v15  ;;  %v482_v26 = vld [vmem:[%s4627_s1 + $0xe20] sm:$0xff]  ;;  %v292_v30 = vld [vmem:[%s4627_s1 + $0x830] sm:$0xff] }
  0xcf   :  { %2158 = vmatpush1.bf16.msra.mxu0 %v2157_v61  ;;  %v286_v27 = vld [vmem:[%s4627_s1 + $0x800] sm:$0xff]  ;;  %v2167_v28 = vpack.c.bf16 %v293_v21, %v287_v20  ;;  %v489_v31 = vld [vmem:[%s4627_s1 + $0xe58] sm:$0xff]  ;;  %v495_v32 = vld [vmem:[%s4627_s1 + $0xe88] sm:$0xff]  ;;  %v2041_v35 = vpack.c.bf16 %v482_v26, %v476_v25 }
  0xd0   :  { %2160 = vmatprep.subr.bf16.mxu0 %v2159_v1  ;;  %v299_v33 = vld [vmem:[%s4627_s1 + $0x868] sm:$0xff]  ;;  %v305_v34 = vld [vmem:[%s4627_s1 + $0x898] sm:$0xff]  ;;  %v2169_v36 = vpack.c.bf16 %v292_v30, %v286_v27  ;;  %v2043_v37 = vpack.c.bf16 %v495_v32, %v489_v31  ;;  %v488_v38 = vld [vmem:[%s4627_s1 + $0xe50] sm:$0xff] }
  0xd1   :  { %2034 = vmatpush1.bf16.msra.mxu1 %v2033_v7  ;;  %v494_v39 = vld [vmem:[%s4627_s1 + $0xe80] sm:$0xff]  ;;  %v2171_v41 = vpack.c.bf16 %v305_v34, %v299_v33  ;;  %v304_v42 = vld [vmem:[%s4627_s1 + $0x890] sm:$0xff]  ;;  %v501_v43 = vld [vmem:[%s4627_s1 + $0xeb8] sm:$0xff] }
  0xd2   :  { %2036 = vmatprep.subr.bf16.mxu1 %v2035_v9  ;;  %v298_v40 = vld [vmem:[%s4627_s1 + $0x860] sm:$0xff]  ;;  %v507_v44 = vld [vmem:[%s4627_s1 + $0xee8] sm:$0xff]  ;;  %v317_v47 = vld [vmem:[%s4627_s1 + $0x8f8] sm:$0xff]  ;;  %v2045_v48 = vpack.c.bf16 %v494_v39, %v488_v38 }
  0xd3   :  { %2162 = vmatpush1.bf16.msra.mxu0 %v2161_v8  ;;  %v311_v45 = vld [vmem:[%s4627_s1 + $0x8c8] sm:$0xff]  ;;  %v2173_v17 = vpack.c.bf16 %v304_v42, %v298_v40  ;;  %v2047_v49 = vpack.c.bf16 %v507_v44, %v501_v43  ;;  %v500_v50 = vld [vmem:[%s4627_s1 + $0xeb0] sm:$0xff]  ;;  %v506_v51 = vld [vmem:[%s4627_s1 + $0xee0] sm:$0xff] }
  0xd4   :  { %2164 = vmatprep.subr.bf16.mxu0 %v2163_v13  ;;  %v310_v52 = vld [vmem:[%s4627_s1 + $0x8c0] sm:$0xff]  ;;  %v2175_v53 = vpack.c.bf16 %v317_v47, %v311_v45  ;;  %v316_v54 = vld [vmem:[%s4627_s1 + $0x8f0] sm:$0xff]  ;;  %v513_v55 = vld [vmem:[%s4627_s1 + $0xf18] sm:$0xff]  ;;  %v2049_v19 = vpack.c.bf16 %v506_v51, %v500_v50 }
  0xd5   :  { %2038 = vmatpush1.bf16.msra.mxu1 %v2037_v22  ;;  %v519_v56 = vld [vmem:[%s4627_s1 + $0xf48] sm:$0xff]  ;;  %v329_v58 = vld [vmem:[%s4627_s1 + $0x958] sm:$0xff]  ;;  %v2177_v59 = vpack.c.bf16 %v316_v54, %v310_v52  ;;  %v512_v16 = vld [vmem:[%s4627_s1 + $0xf10] sm:$0xff] }
  0xd6   :  { %2040 = vmatprep.subr.bf16.mxu1 %v2039_v24  ;;  %v323_v57 = vld [vmem:[%s4627_s1 + $0x928] sm:$0xff]  ;;  %v2051_v60 = vpack.c.bf16 %v519_v56, %v513_v55  ;;  %v518_v61 = vld [vmem:[%s4627_s1 + $0xf40] sm:$0xff]  ;;  %v328_v63 = vld [vmem:[%s4627_s1 + $0x950] sm:$0xff] }
  0xd7   :  { %2166 = vmatpush1.bf16.msra.mxu0 %v2165_v23  ;;  %v322_v62 = vld [vmem:[%s4627_s1 + $0x920] sm:$0xff]  ;;  %v2179_v29 = vpack.c.bf16 %v329_v58, %v323_v57  ;;  %v525_v0 = vld [vmem:[%s4627_s1 + $0xf78] sm:$0xff]  ;;  %v531_v1 = vld [vmem:[%s4627_s1 + $0xfa8] sm:$0xff]  ;;  %v2053_v4 = vpack.c.bf16 %v518_v61, %v512_v16 }
  0xd8   :  { %2168 = vmatprep.subr.bf16.mxu0 %v2167_v28  ;;  %v335_v2 = vld [vmem:[%s4627_s1 + $0x988] sm:$0xff]  ;;  %v341_v3 = vld [vmem:[%s4627_s1 + $0x9b8] sm:$0xff]  ;;  %v2181_v5 = vpack.c.bf16 %v328_v63, %v322_v62  ;;  %v2055_v6 = vpack.c.bf16 %v531_v1, %v525_v0  ;;  %v524_v7 = vld [vmem:[%s4627_s1 + $0xf70] sm:$0xff] }
  0xd9   :  { %2042 = vmatpush1.bf16.msra.mxu1 %v2041_v35  ;;  %v530_v8 = vld [vmem:[%s4627_s1 + $0xfa0] sm:$0xff]  ;;  %v2183_v10 = vpack.c.bf16 %v341_v3, %v335_v2  ;;  %v340_v11 = vld [vmem:[%s4627_s1 + $0x9b0] sm:$0xff]  ;;  %v537_v12 = vld [vmem:[%s4627_s1 + $0xfd8] sm:$0xff] }
  0xda   :  { %2044 = vmatprep.subr.bf16.mxu1 %v2043_v37  ;;  %v334_v9 = vld [vmem:[%s4627_s1 + $0x980] sm:$0xff]  ;;  %v543_v13 = vld [vmem:[%s4627_s1 + $0x1008] sm:$0xff]  ;;  %v353_v15 = vld [vmem:[%s4627_s1 + $0xa18] sm:$0xff]  ;;  %v2057_v18 = vpack.c.bf16 %v530_v8, %v524_v7 }
  0xdb   :  { %2170 = vmatpush1.bf16.msra.mxu0 %v2169_v36  ;;  %v347_v14 = vld [vmem:[%s4627_s1 + $0x9e8] sm:$0xff]  ;;  %v2185_v20 = vpack.c.bf16 %v340_v11, %v334_v9  ;;  %v2059_v21 = vpack.c.bf16 %v543_v13, %v537_v12  ;;  %v536_v22 = vld [vmem:[%s4627_s1 + $0xfd0] sm:$0xff]  ;;  %v542_v23 = vld [vmem:[%s4627_s1 + $0x1000] sm:$0xff] }
  0xdc   :  { %2172 = vmatprep.subr.bf16.mxu0 %v2171_v41  ;;  %v346_v24 = vld [vmem:[%s4627_s1 + $0x9e0] sm:$0xff]  ;;  %v2187_v25 = vpack.c.bf16 %v353_v15, %v347_v14  ;;  %v352_v26 = vld [vmem:[%s4627_s1 + $0xa10] sm:$0xff]  ;;  %v549_v27 = vld [vmem:[%s4627_s1 + $0x1038] sm:$0xff]  ;;  %v2061_v32 = vpack.c.bf16 %v542_v23, %v536_v22 }
  0xdd   :  { %2046 = vmatpush1.bf16.msra.mxu1 %v2045_v48  ;;  %v555_v28 = vld [vmem:[%s4627_s1 + $0x1068] sm:$0xff]  ;;  %v365_v31 = vld [vmem:[%s4627_s1 + $0xa78] sm:$0xff]  ;;  %v2189_v33 = vpack.c.bf16 %v352_v26, %v346_v24  ;;  %v548_v35 = vld [vmem:[%s4627_s1 + $0x1030] sm:$0xff] }
  0xde   :  { %2048 = vmatprep.subr.bf16.mxu1 %v2047_v49  ;;  %v359_v30 = vld [vmem:[%s4627_s1 + $0xa48] sm:$0xff]  ;;  %v2063_v34 = vpack.c.bf16 %v555_v28, %v549_v27  ;;  %v554_v36 = vld [vmem:[%s4627_s1 + $0x1060] sm:$0xff]  ;;  %v364_v39 = vld [vmem:[%s4627_s1 + $0xa70] sm:$0xff] }
  0xdf   :  { %2174 = vmatpush1.bf16.msra.mxu0 %v2173_v17  ;;  %v358_v37 = vld [vmem:[%s4627_s1 + $0xa40] sm:$0xff]  ;;  %v2191_v38 = vpack.c.bf16 %v365_v31, %v359_v30  ;;  %v561_v40 = vld [vmem:[%s4627_s1 + $0x1098] sm:$0xff]  ;;  %v567_v41 = vld [vmem:[%s4627_s1 + $0x10c8] sm:$0xff]  ;;  %v2065_v44 = vpack.c.bf16 %v554_v36, %v548_v35 }
  0xe0   :  { %2176 = vmatprep.subr.bf16.mxu0 %v2175_v53  ;;  %v371_v42 = vld [vmem:[%s4627_s1 + $0xaa8] sm:$0xff]  ;;  %v377_v43 = vld [vmem:[%s4627_s1 + $0xad8] sm:$0xff]  ;;  %v2193_v45 = vpack.c.bf16 %v364_v39, %v358_v37  ;;  %v2067_v47 = vpack.c.bf16 %v567_v41, %v561_v40  ;;  %v560_v48 = vld [vmem:[%s4627_s1 + $0x1090] sm:$0xff] }
  0xe1   :  { %2050 = vmatpush1.bf16.msra.mxu1 %v2049_v19  ;;  %v566_v17 = vld [vmem:[%s4627_s1 + $0x10c0] sm:$0xff]  ;;  %v2195_v50 = vpack.c.bf16 %v377_v43, %v371_v42  ;;  %v376_v51 = vld [vmem:[%s4627_s1 + $0xad0] sm:$0xff]  ;;  %v573_v52 = vld [vmem:[%s4627_s1 + $0x10f8] sm:$0xff] }
  0xe2   :  { %2052 = vmatprep.subr.bf16.mxu1 %v2051_v60  ;;  %v370_v49 = vld [vmem:[%s4627_s1 + $0xaa0] sm:$0xff]  ;;  %v579_v53 = vld [vmem:[%s4627_s1 + $0x1128] sm:$0xff]  ;;  %v389_v55 = vld [vmem:[%s4627_s1 + $0xb38] sm:$0xff]  ;;  %v2069_v56 = vpack.c.bf16 %v566_v17, %v560_v48 }
  0xe3   :  { %2178 = vmatpush1.bf16.msra.mxu0 %v2177_v59  ;;  %v383_v54 = vld [vmem:[%s4627_s1 + $0xb08] sm:$0xff]  ;;  %v2197_v57 = vpack.c.bf16 %v376_v51, %v370_v49  ;;  %v2071_v58 = vpack.c.bf16 %v579_v53, %v573_v52  ;;  %v572_v19 = vld [vmem:[%s4627_s1 + $0x10f0] sm:$0xff]  ;;  %v578_v59 = vld [vmem:[%s4627_s1 + $0x1120] sm:$0xff] }
  0xe4   :  { %2180 = vmatprep.subr.bf16.mxu0 %v2179_v29  ;;  %v382_v60 = vld [vmem:[%s4627_s1 + $0xb00] sm:$0xff]  ;;  %v2199_v16 = vpack.c.bf16 %v389_v55, %v383_v54  ;;  %v388_v61 = vld [vmem:[%s4627_s1 + $0xb30] sm:$0xff]  ;;  %v585_v62 = vld [vmem:[%s4627_s1 + $0x1158] sm:$0xff]  ;;  %v2073_v1 = vpack.c.bf16 %v578_v59, %v572_v19 }
  0xe5   :  { %2054 = vmatpush1.bf16.msra.mxu1 %v2053_v4  ;;  %v591_v29 = vld [vmem:[%s4627_s1 + $0x1188] sm:$0xff]  ;;  %v401_v0 = vld [vmem:[%s4627_s1 + $0xb98] sm:$0xff]  ;;  %v2201_v2 = vpack.c.bf16 %v388_v61, %v382_v60  ;;  %v584_v4 = vld [vmem:[%s4627_s1 + $0x1150] sm:$0xff] }
  0xe6   :  { %2056 = vmatprep.subr.bf16.mxu1 %v2055_v6  ;;  %v395_v63 = vld [vmem:[%s4627_s1 + $0xb68] sm:$0xff]  ;;  %v2075_v3 = vpack.c.bf16 %v591_v29, %v585_v62  ;;  %v394_v6 = vld [vmem:[%s4627_s1 + $0xb60] sm:$0xff]  ;;  %v400_v8 = vld [vmem:[%s4627_s1 + $0xb90] sm:$0xff] }
  0xe7   :  { %2182 = vmatpush1.bf16.msra.mxu0 %v2181_v5  ;;  %v590_v5 = vld [vmem:[%s4627_s1 + $0x1180] sm:$0xff]  ;;  %v2203_v7 = vpack.c.bf16 %v401_v0, %v395_v63  ;;  %v597_v9 = vld [vmem:[%s4627_s1 + $0x11b8] sm:$0xff]  ;;  %v407_v11 = vld [vmem:[%s4627_s1 + $0xbc8] sm:$0xff]  ;;  %v2205_v14 = vpack.c.bf16 %v400_v8, %v394_v6 }
  0xe8   :  { %2184 = vmatprep.subr.bf16.mxu0 %v2183_v10  ;;  %v603_v10 = vld [vmem:[%s4627_s1 + $0x11e8] sm:$0xff]  ;;  %v413_v12 = vld [vmem:[%s4627_s1 + $0xbf8] sm:$0xff]  ;;  %v2077_v13 = vpack.c.bf16 %v590_v5, %v584_v4  ;;  %v412_v23 = vld [vmem:[%s4627_s1 + $0xbf0] sm:$0xff] }
  0xe9   :  { %2058 = vmatpush1.bf16.msra.mxu1 %v2057_v18  ;;  %v2079_v15 = vpack.c.bf16 %v603_v10, %v597_v9  ;;  %v596_v18 = vld [vmem:[%s4627_s1 + $0x11b0] sm:$0xff]  ;;  %v2207_v22 = vpack.c.bf16 %v413_v12, %v407_v11  ;;  %v1332_v24 = vld [vmem:[%s4629_s3 + $0x180] sm:$0xff]  ;;  %v419_v26 = vld [vmem:[%s4627_s1 + $0xc28] sm:$0xff] }
  0xea   :  { %2060 = vmatprep.subr.bf16.mxu1 %v2059_v21  ;;  %v406_v21 = vld [vmem:[%s4627_s1 + $0xbc0] sm:$0xff]  ;;  %v425_v27 = vld [vmem:[%s4627_s1 + $0xc58] sm:$0xff]  ;;  %v424_v36 = vld [vmem:[%s4627_s1 + $0xc50] sm:$0xff] }
  0xeb   :  { %2186 = vmatpush1.bf16.msra.mxu0 %v2185_v20  ;;  %v602_v20 = vld [vmem:[%s4627_s1 + $0x11e0] sm:$0xff]  ;;  %v2209_v30 = vpack.c.bf16 %v412_v23, %v406_v21  ;;  %v431_v37 = vld [vmem:[%s4627_s1 + $0xc88] sm:$0xff]  ;;  %v1334_v39 = vld [vmem:[%s4629_s3 + $0x190] sm:$0xff] }
  0xec   :  { %2188 = vmatprep.subr.bf16.mxu0 %v2187_v25  ;;  %v1333_v25 = vld [vmem:[%s4629_s3 + $0x188] sm:$0xff]  ;;  %v2081_v28 = vpack.c.bf16 %v602_v20, %v596_v18  ;;  %v418_v35 = vld [vmem:[%s4627_s1 + $0xc20] sm:$0xff]  ;;  %v1335_v40 = vld [vmem:[%s4629_s3 + $0x198] sm:$0xff] }
  0xed   :  { %2062 = vmatpush1.bf16.msra.mxu1 %v2061_v32  ;;  %v2307_v31 = vpack.c.bf16 %v1333_v25, %v1332_v24  ;;  %v1316_v32 = vld [vmem:[%s4629_s3 + $0x100] sm:$0xff]  ;;  %v2213_v42 = vpack.c.bf16 %v424_v36, %v418_v35  ;;  %v436_v48 = vld [vmem:[%s4627_s1 + $0xcb0] sm:$0xff]  ;;  %v2311_v17 = vpack.c.bf16 %v1335_v40, %v1334_v39  ;;  %v443_v52 = vld [vmem:[%s4627_s1 + $0xce8] sm:$0xff] }
  0xee   :  { %2064 = vmatprep.subr.bf16.mxu1 %v2063_v34  ;;  %v2211_v34 = vpack.c.bf16 %v425_v27, %v419_v26  ;;  %v430_v43 = vld [vmem:[%s4627_s1 + $0xc80] sm:$0xff]  ;;  %v449_v53 = vld [vmem:[%s4627_s1 + $0xd18] sm:$0xff]  ;;  %v448_v60 = vld [vmem:[%s4627_s1 + $0xd10] sm:$0xff] }
  0xef   :  { %2190 = vmatpush1.bf16.msra.mxu0 %v2189_v33  ;;  %v1317_v33 = vld [vmem:[%s4629_s3 + $0x108] sm:$0xff]  ;;  %v1336_v49 = vld [vmem:[%s4629_s3 + $0x1a0] sm:$0xff]  ;;  %v2217_v55 = vpack.c.bf16 %v436_v48, %v430_v43  ;;  %v2219_v59 = vpack.c.bf16 %v449_v53, %v443_v52  ;;  %v1339_v61 = vld [vmem:[%s4629_s3 + $0x1b8] sm:$0xff] }
  0xf0   :  { %2192 = vmatprep.subr.bf16.mxu0 %v2191_v38  ;;  %v437_v38 = vld [vmem:[%s4627_s1 + $0xcb8] sm:$0xff]  ;;  %v2309_v41 = vpack.c.bf16 %v1317_v33, %v1316_v32  ;;  %v4135_v51 = vld [vmem:[%s4626_s0 + $0x20] sm:$0xff]  ;;  %v455_v62 = vld [vmem:[%s4627_s1 + $0xd48] sm:$0xff] }
  0xf1   :  { %2066 = vmatpush1.bf16.msra.mxu1 %v2065_v44  ;;  %v1318_v44 = vld [vmem:[%s4629_s3 + $0x110] sm:$0xff]  ;;  %v1320_v19 = vld [vmem:[%s4629_s3 + $0x120] sm:$0xff]  ;;  %v461_v29 = vld [vmem:[%s4627_s1 + $0xd78] sm:$0xff] }
  0xf2   :  { %2068 = vmatprep.subr.bf16.mxu1 %v2067_v47  ;;  %v2215_v47 = vpack.c.bf16 %v437_v38, %v431_v37  ;;  %v1323_v4 = vld [vmem:[%s4629_s3 + $0x138] sm:$0xff]  ;;  %v2223_v5 = vpack.c.bf16 %v461_v29, %v455_v62  ;;  %v460_v6 = vld [vmem:[%s4627_s1 + $0xd70] sm:$0xff]  ;;  %v1341_v8 = vld [vmem:[%s4629_s3 + $0x1c8] sm:$0xff] }
  0xf3   :  { %2194 = vmatpush1.bf16.msra.mxu0 %v2193_v45  ;;  %v1319_v45 = vld [vmem:[%s4629_s3 + $0x118] sm:$0xff]  ;;  %v467_v9 = vld [vmem:[%s4627_s1 + $0xda8] sm:$0xff]  ;;  %v472_v21 = vld [vmem:[%s4627_s1 + $0xdd0] sm:$0xff] }
  0xf4   :  { %2196 = vmatprep.subr.bf16.mxu0 %v2195_v50  ;;  %v1337_v50 = vld [vmem:[%s4629_s3 + $0x1a8] sm:$0xff]  ;;  %v2313_v54 = vpack.c.bf16 %v1319_v45, %v1318_v44  ;;  %v473_v10 = vld [vmem:[%s4627_s1 + $0xdd8] sm:$0xff]  ;;  %v1344_v35 = vld [vmem:[%s4629_s3 + $0x1e0] sm:$0xff] }
  0xf5   :  { %2070 = vmatpush1.bf16.msra.mxu1 %v2069_v56  ;;  %v442_v56 = vld [vmem:[%s4627_s1 + $0xce0] sm:$0xff]  ;;  %v1325_v18 = vld [vmem:[%s4629_s3 + $0x148] sm:$0xff]  ;;  %v2227_v20 = vpack.c.bf16 %v473_v10, %v467_v9  ;;  %v1343_v23 = vld [vmem:[%s4629_s3 + $0x1d8] sm:$0xff] }
  0xf6   :  { %2072 = vmatprep.subr.bf16.mxu1 %v2071_v58  ;;  %v2315_v58 = vpack.c.bf16 %v1337_v50, %v1336_v49  ;;  %v2221_v0 = vpack.c.bf16 %v448_v60, %v442_v56  ;;  %v479_v24 = vld [vmem:[%s4627_s1 + $0xe08] sm:$0xff]  ;;  %v485_v25 = vld [vmem:[%s4627_s1 + $0xe38] sm:$0xff]  ;;  %v490_v45 = vld [vmem:[%s4627_s1 + $0xe60] sm:$0xff] }
  0xf7   :  { %2198 = vmatpush1.bf16.msra.mxu0 %v2197_v57  ;;  %v2407_v57 = vld [vmem:[%s4626_s0 + $0x28] sm:$0xff]  ;;  %v1327_v32 = vld [vmem:[%s4629_s3 + $0x158] sm:$0xff]  ;;  %v2231_v33 = vpack.c.bf16 %v485_v25, %v479_v24  ;;  %v508_v56 = vld [vmem:[%s4627_s1 + $0xef0] sm:$0xff] }
  0xf8   :  { %2200 = vmatprep.subr.bf16.mxu0 %v2199_v16  ;;  %v1338_v16 = vld [vmem:[%s4629_s3 + $0x1b0] sm:$0xff]  ;;  %v1345_v36 = vld [vmem:[%s4629_s3 + $0x1e8] sm:$0xff]  ;;  %v497_v38 = vld [vmem:[%s4627_s1 + $0xe98] sm:$0xff] }
  0xf9   :  { %2074 = vmatpush1.bf16.msra.mxu1 %v2073_v1  ;;  %v454_v1 = vld [vmem:[%s4627_s1 + $0xd40] sm:$0xff]  ;;  %v491_v37 = vld [vmem:[%s4627_s1 + $0xe68] sm:$0xff]  ;;  %v509_v50 = vld [vmem:[%s4627_s1 + $0xef8] sm:$0xff] }
  0xfa   :  { %2076 = vmatprep.subr.bf16.mxu1 %v2075_v3  ;;  %v1322_v3 = vld [vmem:[%s4629_s3 + $0x130] sm:$0xff]  ;;  %v2225_v12 = vpack.c.bf16 %v460_v6, %v454_v1  ;;  %v1329_v43 = vld [vmem:[%s4629_s3 + $0x168] sm:$0xff]  ;;  %v2235_v44 = vpack.c.bf16 %v497_v38, %v491_v37 }
  0xfb   :  { %2202 = vmatpush1.bf16.msra.mxu0 %v2201_v2  ;;  %v2319_v2 = vpack.c.bf16 %v1339_v61, %v1338_v16  ;;  %v2321_v11 = vpack.c.bf16 %v1323_v4, %v1322_v3  ;;  %v503_v49 = vld [vmem:[%s4627_s1 + $0xec8] sm:$0xff]  ;;  %v520_v60 = vld [vmem:[%s4627_s1 + $0xf50] sm:$0xff]  ;;  %v533_v61 = vld [vmem:[%s4627_s1 + $0xfb8] sm:$0xff] }
  0xfc   :  { %2204 = vmatprep.subr.bf16.mxu0 %v2203_v7  ;;  %v1340_v7 = vld [vmem:[%s4629_s3 + $0x1c0] sm:$0xff]  ;;  %v527_v16 = vld [vmem:[%s4627_s1 + $0xf88] sm:$0xff]  ;;  %v544_v6 = vld [vmem:[%s4627_s1 + $0x1010] sm:$0xff] }
  0xfd   :  { %2078 = vmatpush1.bf16.msra.mxu1 %v2077_v13  ;;  %v466_v13 = vld [vmem:[%s4627_s1 + $0xda0] sm:$0xff]  ;;  %v2247_v29 = vpack.c.bf16 %v533_v61, %v527_v16  ;;  %v539_v1 = vld [vmem:[%s4627_s1 + $0xfe8] sm:$0xff]  ;;  %v1306_v16 = vld [vmem:[%s4629_s3 + $0xb0] sm:$0xff] }
  0xfe   :  { %2080 = vmatprep.subr.bf16.mxu1 %v2079_v15  ;;  %v1324_v15 = vld [vmem:[%s4629_s3 + $0x140] sm:$0xff]  ;;  %v2229_v27 = vpack.c.bf16 %v472_v21, %v466_v13  ;;  %v563_v13 = vld [vmem:[%s4627_s1 + $0x10a8] sm:$0xff]  ;;  %v568_v21 = vld [vmem:[%s4627_s1 + $0x10d0] sm:$0xff] }
  0xff   :  { %2206 = vmatpush1.bf16.msra.mxu0 %v2205_v14  ;;  %v2323_v14 = vpack.c.bf16 %v1341_v8, %v1340_v7  ;;  %v2325_v26 = vpack.c.bf16 %v1325_v18, %v1324_v15  ;;  %v551_v7 = vld [vmem:[%s4627_s1 + $0x1048] sm:$0xff]  ;;  %v557_v8 = vld [vmem:[%s4627_s1 + $0x1078] sm:$0xff] }
 0x100   :  { %2208 = vmatprep.subr.bf16.mxu0 %v2207_v22  ;;  %v1342_v22 = vld [vmem:[%s4629_s3 + $0x1d0] sm:$0xff]  ;;  %v2255_v10 = vpack.c.bf16 %v557_v8, %v551_v7  ;;  %v1293_v7 = vld [vmem:[%s4629_s3 + $0x48] sm:$0xff]  ;;  %v4435_v8 = vld [vmem:[%s4628_s2] sm:$0x3f] }
 0x101   :  { %2082 = vmatpush1.bf16.msra.mxu1 %v2081_v28  ;;  %v478_v28 = vld [vmem:[%s4627_s1 + $0xe00] sm:$0xff] }
 0x102   :  { %2308 = vmatprep.subr.bf16.mxu1 %v2307_v31  ;;  %v1326_v31 = vld [vmem:[%s4629_s3 + $0x150] sm:$0xff] }
 0x103   :  { %2210 = vmatpush1.bf16.msra.mxu0 %v2209_v30  ;;  %v2327_v30 = vpack.c.bf16 %v1343_v23, %v1342_v22  ;;  %v2329_v39 = vpack.c.bf16 %v1327_v32, %v1326_v31  ;;  %v575_v22 = vld [vmem:[%s4627_s1 + $0x1108] sm:$0xff]  ;;  %v581_v23 = vld [vmem:[%s4627_s1 + $0x1138] sm:$0xff] }
 0x104   :  { %2212 = vmatprep.subr.bf16.mxu0 %v2211_v34  ;;  %1058 = vmatmul.mubr.f32.vlgmr.msra.gmra.mrb[2].mxu1 %v4135_v51  ;;  %v484_v34 = vld [vmem:[%s4627_s1 + $0xe30] sm:$0xff]  ;;  %v2263_v25 = vpack.c.bf16 %v581_v23, %v575_v22  ;;  %v1313_v22 = vld [vmem:[%s4629_s3 + $0xe8] sm:$0xff] }
 0x105   :  { %2310 = vmatpush3.bf16.msra.mxu1 %v2309_v41  ;;  %v2233_v40 = vpack.c.bf16 %v484_v34, %v478_v28  ;;  %v2331_v41 = vpack.c.bf16 %v1345_v36, %v1344_v35  ;;  %v587_v28 = vld [vmem:[%s4627_s1 + $0x1168] sm:$0xff]  ;;  %v592_v34 = vld [vmem:[%s4627_s1 + $0x1190] sm:$0xff]  ;;  %v605_v36 = vld [vmem:[%s4627_s1 + $0x11f8] sm:$0xff] }
 0x106   :  { %1200 = vmatmul.mubr.f32.vlgmr.msra.gmra.mrb[2].mxu0 %v3738_v46  ;;  %v1321_v46 = vld [vmem:[%s4629_s3 + $0x128] sm:$0xff]  ;;  %2312 = vmatprep.subr.bf16.mxu1 %v2311_v17 }
 0x107   :  { %2214 = vmatpush1.bf16.msra.mxu0 %v2213_v42  ;;  %1270 = vmatprep.mubr.f32.mxu0 %v2407_v57  ;;  %v2317_v63 = vpack.c.bf16 %v1321_v46, %v1320_v19  ;;  %v1328_v42 = vld [vmem:[%s4629_s3 + $0x160] sm:$0xff]  ;;  %v515_v57 = vld [vmem:[%s4627_s1 + $0xf28] sm:$0xff] }
 0x108   :  { %2216 = vmatprep.subr.bf16.mxu0 %v2215_v47  ;;  %v496_v47 = vld [vmem:[%s4627_s1 + $0xe90] sm:$0xff]  ;;  %v2333_v52 = vpack.c.bf16 %v1329_v43, %v1328_v42  ;;  %v599_v35 = vld [vmem:[%s4627_s1 + $0x11c8] sm:$0xff] }
 0x109   :  { %2314 = vmatpush3.bf16.msra.mxu1 %v2313_v54  ;;  %v2237_v53 = vpack.c.bf16 %v496_v47, %v490_v45  ;;  %v2239_v54 = vpack.c.bf16 %v509_v50, %v503_v49  ;;  %v2271_v38 = vpack.c.bf16 %v605_v36, %v599_v35  ;;  %v1301_v42 = vld [vmem:[%s4629_s3 + $0x88] sm:$0xff]  ;;  %v1284_v45 = vld [vmem:[%s4629_s3] sm:$0xff]  ;;  %v1302_v49 = vld [vmem:[%s4629_s3 + $0x90] sm:$0xff] }
 0x10a   :  { %2316 = vmatprep.subr.bf16.mxu1 %v2315_v58  ;;  %v521_v58 = vld [vmem:[%s4627_s1 + $0xf58] sm:$0xff]  ;;  %v1285_v47 = vld [vmem:[%s4629_s3 + $0x8] sm:$0xff] }
 0x10b   :  { %2218 = vmatpush1.bf16.msra.mxu0 %v2217_v55  ;;  %v502_v55 = vld [vmem:[%s4627_s1 + $0xec0] sm:$0xff]  ;;  %v2243_v46 = vpack.c.bf16 %v521_v58, %v515_v57  ;;  %v1303_v50 = vld [vmem:[%s4629_s3 + $0x98] sm:$0xff]  ;;  %v1305_v57 = vld [vmem:[%s4629_s3 + $0xa8] sm:$0xff] }
 0x10c   :  { %2220 = vmatprep.subr.bf16.mxu0 %v2219_v59  ;;  %v2241_v19 = vpack.c.bf16 %v508_v56, %v502_v55  ;;  %v514_v59 = vld [vmem:[%s4627_s1 + $0xf20] sm:$0xff]  ;;  %v1287_v55 = vld [vmem:[%s4629_s3 + $0x18] sm:$0xff] }
 0x10d   :  { %2318 = vmatpush3.bf16.msra.mxu1 %v2317_v63  ;;  %v2245_v62 = vpack.c.bf16 %v520_v60, %v514_v59  ;;  %v526_v63 = vld [vmem:[%s4627_s1 + $0xf80] sm:$0xff]  ;;  %v1289_v60 = vld [vmem:[%s4629_s3 + $0x28] sm:$0xff]  ;;  %v1315_v36 = vld [vmem:[%s4629_s3 + $0xf8] sm:$0xff] }
 0x10e   :  { %2320 = vmatprep.subr.bf16.mxu1 %v2319_v2  ;;  %v545_v2 = vld [vmem:[%s4627_s1 + $0x1018] sm:$0xff]  ;;  %v1304_v56 = vld [vmem:[%s4629_s3 + $0xa0] sm:$0xff] }
 0x10f   :  { %2222 = vmatpush1.bf16.msra.mxu0 %v2221_v0  ;;  %v532_v0 = vld [vmem:[%s4627_s1 + $0xfb0] sm:$0xff]  ;;  %v2251_v4 = vpack.c.bf16 %v545_v2, %v539_v1  ;;  %v1288_v59 = vld [vmem:[%s4629_s3 + $0x20] sm:$0xff]  ;;  %v1309_v2 = vld [vmem:[%s4629_s3 + $0xc8] sm:$0xff] }
 0x110   :  { %2224 = vmatprep.subr.bf16.mxu0 %v2223_v5  ;;  %v2249_v3 = vpack.c.bf16 %v532_v0, %v526_v63  ;;  %v538_v5 = vld [vmem:[%s4627_s1 + $0xfe0] sm:$0xff]  ;;  %v2285_v61 = vpack.c.bf16 %v1289_v60, %v1288_v59  ;;  %v1290_v63 = vld [vmem:[%s4629_s3 + $0x30] sm:$0xff]  ;;  %v1291_v0 = vld [vmem:[%s4629_s3 + $0x38] sm:$0xff] }
 0x111   :  { %2322 = vmatpush3.bf16.msra.mxu1 %v2321_v11  ;;  %v2253_v9 = vpack.c.bf16 %v544_v6, %v538_v5  ;;  %v550_v11 = vld [vmem:[%s4627_s1 + $0x1040] sm:$0xff]  ;;  %v1351_v59 = vld [vmem:[%s4629_s3 + $0x218] sm:$0xff] }
 0x112   :  { %2324 = vmatprep.subr.bf16.mxu1 %v2323_v14  ;;  %v569_v14 = vld [vmem:[%s4627_s1 + $0x10d8] sm:$0xff]  ;;  %v1308_v1 = vld [vmem:[%s4629_s3 + $0xc0] sm:$0xff] }
 0x113   :  { %2226 = vmatpush1.bf16.msra.mxu0 %v2225_v12  ;;  %v556_v12 = vld [vmem:[%s4627_s1 + $0x1070] sm:$0xff]  ;;  %v2259_v18 = vpack.c.bf16 %v569_v14, %v563_v13  ;;  %v2291_v5 = vpack.c.bf16 %v1309_v2, %v1308_v1  ;;  %v1292_v6 = vld [vmem:[%s4629_s3 + $0x40] sm:$0xff]  ;;  %v1357_v2 = vld [vmem:[%s4629_s3 + $0x248] sm:$0xff] }
 0x114   :  { %2228 = vmatprep.subr.bf16.mxu0 %v2227_v20  ;;  %v2257_v15 = vpack.c.bf16 %v556_v12, %v550_v11  ;;  %v562_v20 = vld [vmem:[%s4627_s1 + $0x10a0] sm:$0xff]  ;;  %v1311_v11 = vld [vmem:[%s4629_s3 + $0xd8] sm:$0xff]  ;;  %v2293_v12 = vpack.c.bf16 %v1293_v7, %v1292_v6 }
 0x115   :  { %2326 = vmatpush3.bf16.msra.mxu1 %v2325_v26  ;;  %v2261_v24 = vpack.c.bf16 %v568_v21, %v562_v20  ;;  %v574_v26 = vld [vmem:[%s4627_s1 + $0x1100] sm:$0xff] }
 0x116   :  { %2328 = vmatprep.subr.bf16.mxu1 %v2327_v30  ;;  %v593_v30 = vld [vmem:[%s4627_s1 + $0x1198] sm:$0xff]  ;;  %v1312_v21 = vld [vmem:[%s4629_s3 + $0xe0] sm:$0xff] }
 0x117   :  { %2230 = vmatpush1.bf16.msra.mxu0 %v2229_v27  ;;  %v4256_v48 = vpop.f32.mrb[0].mxu1  ;;  %v580_v27 = vld [vmem:[%s4627_s1 + $0x1130] sm:$0xff]  ;;  %v2267_v32 = vpack.c.bf16 %v593_v30, %v587_v28  ;;  %v2299_v28 = vpack.c.bf16 %v1313_v22, %v1312_v21  ;;  %v1297_v30 = vld [vmem:[%s4629_s3 + $0x68] sm:$0xff]  ;;  %v1356_v1 = vld [vmem:[%s4629_s3 + $0x240] sm:$0xff] }
 0x118   :  { %2232 = vmatprep.subr.bf16.mxu0 %v2231_v33  ;;  %v4258_v17 = vpop.f32.mrb[1].mxu1  ;;  %v2265_v31 = vpack.c.bf16 %v580_v27, %v574_v26  ;;  %v586_v33 = vld [vmem:[%s4627_s1 + $0x1160] sm:$0xff]  ;;  %v1347_v26 = vld [vmem:[%s4629_s3 + $0x1f8] sm:$0xff] }
 0x119   :  { %2330 = vmatpush3.bf16.msra.mxu1 %v2329_v39  ;;  %v2269_v37 = vpack.c.bf16 %v592_v34, %v586_v33  ;;  %v598_v39 = vld [vmem:[%s4627_s1 + $0x11c0] sm:$0xff]  ;;  %v1331_v33 = vld [vmem:[%s4629_s3 + $0x178] sm:$0xff] }
 0x11a   :  { %2332 = vmatprep.subr.bf16.mxu1 %v2331_v41  ;;  %v1300_v41 = vld [vmem:[%s4629_s3 + $0x80] sm:$0xff]  ;;  %v1367_v21 = vld [vmem:[%s4629_s3 + $0x298] sm:$0xff] }
 0x11b   :  { %2234 = vmatpush1.bf16.msra.mxu0 %v2233_v40  ;;  %v604_v40 = vld [vmem:[%s4627_s1 + $0x11f0] sm:$0xff]  ;;  %v1360_v7 = vld [vmem:[%s4629_s3 + $0x260] sm:$0xff] }
 0x11c   :  { %2236 = vmatprep.subr.bf16.mxu0 %v2235_v44  ;;  %v2273_v43 = vpack.c.bf16 %v604_v40, %v598_v39  ;;  %v2275_v44 = vpack.c.bf16 %v1301_v42, %v1300_v41  ;;  %v1298_v42 = vld [vmem:[%s4629_s3 + $0x70] sm:$0xff] }
 0x11d   :  { %2334 = vmatpush3.bf16.msra.mxu1 %v2333_v52  ;;  %v2277_v52 = vpack.c.bf16 %v1285_v47, %v1284_v45 }
 0x11f   :  { %2238 = vmatpush1.bf16.msra.mxu0 %v2237_v53  ;;  %v2279_v53 = vpack.c.bf16 %v1303_v50, %v1302_v49 }
 0x120   :  { %2240 = vmatprep.subr.bf16.mxu0 %v2239_v54  ;;  %v1286_v54 = vld [vmem:[%s4629_s3 + $0x10] sm:$0xff] }
 0x121   :  { %v2281_v58 = vpack.c.bf16 %v1287_v55, %v1286_v54  ;;  %v1349_v54 = vld [vmem:[%s4629_s3 + $0x208] sm:$0xff] }
 0x123   :  { %2242 = vmatpush1.bf16.msra.mxu0 %v2241_v19  ;;  %v608_v19 = vlaneseq }
 0x124   :  { %2244 = vmatprep.subr.bf16.mxu0 %v2243_v46  ;;  %v2283_v46 = vpack.c.bf16 %v1305_v57, %v1304_v56 }
 0x127   :  { %2246 = vmatpush1.bf16.msra.mxu0 %v2245_v62  ;;  %v4411_v62 = vshrl.u32 %v608_v19, 7 }
 0x128   :  { %2248 = vmatprep.subr.bf16.mxu0 %v2247_v29 }
 0x129   :  { %v618_v47 = vsub.s32 2, %v4411_v62  ;;  %v622_v49 = vsub.s32 3, %v4411_v62 }
 0x12b   :  { %2250 = vmatpush1.bf16.msra.mxu0 %v2249_v3  ;;  %v2289_v3 = vpack.c.bf16 %v1291_v0, %v1290_v63  ;;  %v619_v50 = vrot.slane %v4435_v8, %v618_v47  ;;  %v1355_v63 = vld [vmem:[%s4629_s3 + $0x238] sm:$0xff] }
 0x12c   :  { %2252 = vmatprep.subr.bf16.mxu0 %v2251_v4  ;;  %v610_v4 = vsub.s32 0, %v4411_v62 }
 0x12e   :  { %v611_v13 = vrot.slane %v4435_v8, %v610_v4  ;;  %v1358_v4 = vld [vmem:[%s4629_s3 + $0x250] sm:$0xff] }
 0x12f   :  { %2254 = vmatpush1.bf16.msra.mxu0 %v2253_v9  ;;  %v614_v9 = vsub.s32 1, %v4411_v62 }
 0x130   :  { %2256 = vmatprep.subr.bf16.mxu0 %v2255_v10  ;;  %v1310_v10 = vld [vmem:[%s4629_s3 + $0xd0] sm:$0xff]  ;;  %v705_v27 = vadd.f32 %v4256_v48, %v611_v13 }
 0x131   :  { %v2295_v14 = vpack.c.bf16 %v1311_v11, %v1310_v10  ;;  %v615_v20 = vrot.slane %v4435_v8, %v614_v9  ;;  %v1314_v48 = vld [vmem:[%s4629_s3 + $0xf0] sm:$0xff]  ;;  %v1361_v9 = vld [vmem:[%s4629_s3 + $0x268] sm:$0xff] }
 0x132   :  { %v2358_v10 = vpack.c.bf16 %v1361_v9, %v1360_v7  ;;  %v1362_v11 = vld [vmem:[%s4629_s3 + $0x270] sm:$0xff] }
 0x133   :  { %2258 = vmatpush1.bf16.msra.mxu0 %v2257_v15  ;;  %v1294_v15 = vld [vmem:[%s4629_s3 + $0x50] sm:$0xff]  ;;  %v707_v34 = vadd.f32 %v4258_v17, %v615_v20  ;;  %v2303_v17 = vpack.c.bf16 %v1315_v36, %v1314_v48  ;;  %v626_v48 = vsub.s32 4, %v4411_v62  ;;  %v630_v36 = vsub.s32 5, %v4411_v62 }
 0x134   :  { %2260 = vmatprep.subr.bf16.mxu0 %v2259_v18  ;;  %v1295_v18 = vld [vmem:[%s4629_s3 + $0x58] sm:$0xff]  ;;  %v1366_v20 = vld [vmem:[%s4629_s3 + $0x290] sm:$0xff] }
 0x135   :  { %v2297_v23 = vpack.c.bf16 %v1295_v18, %v1294_v15  ;;  %v1365_v15 = vld [vmem:[%s4629_s3 + $0x288] sm:$0xff]  ;;  %v2367_v22 = vpack.c.bf16 %v1367_v21, %v1366_v20 }
 0x137   :  { %2262 = vmatpush1.bf16.msra.mxu0 %v2261_v24  ;;  %v1296_v24 = vld [vmem:[%s4629_s3 + $0x60] sm:$0xff] }
 0x138   :  { %2264 = vmatprep.subr.bf16.mxu0 %v2263_v25  ;;  %v1346_v25 = vld [vmem:[%s4629_s3 + $0x1f0] sm:$0xff]  ;;  %v2301_v41 = vpack.c.bf16 %v1297_v30, %v1296_v24  ;;  %v1369_v24 = vld [vmem:[%s4629_s3 + $0x2a8] sm:$0xff]  ;;  %v1372_v30 = vld [vmem:[%s4629_s3 + $0x2c0] sm:$0xff] }
 0x13b   :  { %2266 = vmatpush1.bf16.msra.mxu0 %v2265_v31  ;;  %v2335_v31 = vpack.c.bf16 %v1347_v26, %v1346_v25  ;;  %v1370_v26 = vld [vmem:[%s4629_s3 + $0x2b0] sm:$0xff] }
 0x13c   :  { %2268 = vmatprep.subr.bf16.mxu0 %v2267_v32  ;;  %v1330_v32 = vld [vmem:[%s4629_s3 + $0x170] sm:$0xff] }
 0x13d   :  { %2336 = vmatprep.subr.bf16.mxu1 %v2335_v31  ;;  %v1373_v31 = vld [vmem:[%s4629_s3 + $0x2c8] sm:$0xff] }
 0x13f   :  { %2270 = vmatpush1.bf16.msra.mxu0 %v2269_v37  ;;  %v2337_v37 = vpack.c.bf16 %v1331_v33, %v1330_v32  ;;  %v2376_v32 = vpack.c.bf16 %v1373_v31, %v1372_v30  ;;  %v1374_v33 = vld [vmem:[%s4629_s3 + $0x2d0] sm:$0xff] }
 0x140   :  { %2272 = vmatprep.subr.bf16.mxu0 %v2271_v38 }
 0x141   :  { %2338 = vmatpush3.bf16.msra.mxu1 %v2337_v37  ;;  %v2457_v37 = vmov 0.0  }
 0x143   :  { %2274 = vmatpush1.bf16.msra.mxu0 %v2273_v43  ;;  %v1299_v43 = vld [vmem:[%s4629_s3 + $0x78] sm:$0xff] }
 0x144   :  { %2276 = vmatprep.subr.bf16.mxu0 %v2275_v44  ;;  %v2456_v44 = vmov 0.0|0.0   ;;  %v2305_v45 = vpack.c.bf16 %v1299_v43, %v1298_v42 }
 0x145   :  { %2339 = vmatprep.subr.bf16.mxu1 %v2456_v44 }
 0x146   :  { %1271 = vmatmul.mubr.f32.vlgmr.msra.gmra.mrb[2].mxu0 %v4135_v51  ;;  %v1307_v51 = vld [vmem:[%s4629_s3 + $0xb8] sm:$0xff] }
 0x147   :  { %2278 = vmatpush3.bf16.msra.mxu0 %v2277_v52  ;;  %v2287_v29 = vpack.c.bf16 %v1307_v51, %v1306_v16  ;;  %v623_v52 = vrot.slane %v4435_v8, %v622_v49  ;;  %v1352_v16 = vld [vmem:[%s4629_s3 + $0x220] sm:$0xff]  ;;  %v1353_v51 = vld [vmem:[%s4629_s3 + $0x228] sm:$0xff] }
 0x148   :  { %2280 = vmatprep.subr.bf16.mxu0 %v2279_v53  ;;  %v1348_v53 = vld [vmem:[%s4629_s3 + $0x200] sm:$0xff] }
 0x149   :  { %v2340_v19 = vpack.c.bf16 %v1349_v54, %v1348_v53 }
 0x14b   :  { %2282 = vmatpush3.bf16.msra.mxu0 %v2281_v58 }
 0x14c   :  { %2284 = vmatprep.subr.bf16.mxu0 %v2283_v46  ;;  %v1350_v46 = vld [vmem:[%s4629_s3 + $0x210] sm:$0xff] }
 0x14d   :  { %v2343_v60 = vpack.c.bf16 %v1351_v59, %v1350_v46 }
 0x14f   :  { %2286 = vmatpush3.bf16.msra.mxu0 %v2285_v61  ;;  %v2346_v61 = vpack.c.bf16 %v1353_v51, %v1352_v16 }
 0x150   :  { %2288 = vmatprep.subr.bf16.mxu0 %v2287_v29  ;;  %v1354_v29 = vld [vmem:[%s4629_s3 + $0x230] sm:$0xff] }
 0x151   :  { %v2349_v0 = vpack.c.bf16 %v1355_v63, %v1354_v29 }
 0x153   :  { %2290 = vmatpush3.bf16.msra.mxu0 %v2289_v3  ;;  %v2352_v3 = vpack.c.bf16 %v1357_v2, %v1356_v1 }
 0x154   :  { %2292 = vmatprep.subr.bf16.mxu0 %v2291_v5  ;;  %v1359_v5 = vld [vmem:[%s4629_s3 + $0x258] sm:$0xff] }
 0x155   :  { %v2355_v6 = vpack.c.bf16 %v1359_v5, %v1358_v4 }
 0x157   :  { %2294 = vmatpush3.bf16.msra.mxu0 %v2293_v12  ;;  %v1363_v12 = vld [vmem:[%s4629_s3 + $0x278] sm:$0xff] }
 0x158   :  { %2296 = vmatprep.subr.bf16.mxu0 %v2295_v14  ;;  %v846_v35 = vpop.f32.mrb[0].mxu0  ;;  %v2361_v13 = vpack.c.bf16 %v1363_v12, %v1362_v11  ;;  %v1364_v14 = vld [vmem:[%s4629_s3 + $0x280] sm:$0xff] }
 0x159   :  { %v2382_v38 = vadd.f32 %v846_v35, %v705_v27  ;;  %v848_v39 = vpop.f32.mrb[1].mxu0  ;;  %v2364_v18 = vpack.c.bf16 %v1365_v15, %v1364_v14  ;;  %v1371_v27 = vld [vmem:[%s4629_s3 + $0x2b8] sm:$0xff] }
 0x15a   :  { %v2384_v40 = vadd.f32 %v848_v39, %v707_v34  ;;  %v1375_v34 = vld [vmem:[%s4629_s3 + $0x2d8] sm:$0xff]  ;;  %v627_v39 = vrot.slane %v4435_v8, %v626_v48 }
 0x15b   :  { %2298 = vmatpush3.bf16.msra.mxu0 %v2297_v23  ;;  %1277 = vst [vmem:[#allocation2] sm:$0xff] %v2382_v38  ;;  %v1368_v23 = vld [vmem:[%s4629_s3 + $0x2a0] sm:$0xff]  ;;  %v2379_v35 = vpack.c.bf16 %v1375_v34, %v1374_v33 }
 0x15c   :  { %2300 = vmatprep.subr.bf16.mxu0 %v2299_v28  ;;  %1278 = vst [vmem:[#allocation2 + $0x8] sm:$0xff] %v2384_v40  ;;  %1451 = vmatprep.mubr.f32.mxu0 %v2384_v40  ;;  %v2370_v25 = vpack.c.bf16 %v1369_v24, %v1368_v23  ;;  %v2373_v28 = vpack.c.bf16 %v1371_v27, %v1370_v26 }
 0x15d   :  { %v631_v40 = vrot.slane %v4435_v8, %v630_v36 }
 0x15f   :  { %2302 = vmatpush3.bf16.msra.mxu0 %v2301_v41 }
 0x160   :  { %2304 = vmatprep.subr.bf16.mxu0 %v2303_v17 }
 0x163   :  { %2306 = vmatpush3.bf16.msra.mxu0 %v2305_v45 }
 0x166   :  { %1452 = vmatmul.mubr.f32.vlgmr.msra.gmra.mrb[4].mxu0 %v2382_v38  ;;  %v1376_v38 = vld [vmem:[%s4629_s3 + $0x2e0] sm:$0xff]  ;;  %s2408_s3 = scalar_lea.vmem %s1606_s20, 768 }
 0x167   :  { %p2409_p0 = scmp.ne.s32.totalorder %s1606_s20, %s2408_s3  ;;  %p2414_p2 = scmp.lt.s32.totalorder %s2408_s3, %s2408_s3 }
 0x169   :  { %p2415_p3 = por %p2414_p2, %p2413_p1 }
 0x16b   :  { %p2416_p4 = pnand %p2415_p3, %p2409_p0 }
 0x1d7   :  { %v1059_v55 = vpop.f32.mrb[2].mxu1 }
 0x1d8   :  { %v2385_v56 = vadd.f32 %v1059_v55, %v619_v50  ;;  %v1061_v57 = vpop.f32.mrb[3].mxu1 }
 0x1d9   :  { %v2386_v58 = vadd.f32 %v1061_v57, %v623_v52 }
 0x1da   :  { %1279 = vst [vmem:[#allocation2 + $0x10] sm:$0xff] %v2385_v56 }
 0x1db   :  { %1280 = vst [vmem:[#allocation2 + $0x18] sm:$0xff] %v2386_v58  ;;  %1521 = vmatprep.mubr.f32.mxu1 %v2386_v58 }
 0x1dc   :  { %1522 = vmatmul.mubr.f32.vlgmr.msra.gmra.mrb[4].mxu1 %v2385_v56 }
 0x1dd   :  { %2341 = vmatpush1.bf16.msra.mxu1 %v2340_v19 }
 0x1de   :  { %2342 = vmatprep.subr.bf16.mxu1 %v2456_v44 }
 0x1e1   :  { %2344 = vmatpush1.bf16.msra.mxu1 %v2343_v60 }
 0x1e2   :  { %2345 = vmatprep.subr.bf16.mxu1 %v2456_v44 }
 0x1e5   :  { %2347 = vmatpush1.bf16.msra.mxu1 %v2346_v61 }
 0x1e6   :  { %2348 = vmatprep.subr.bf16.mxu1 %v2456_v44 }
 0x1e9   :  { %2350 = vmatpush1.bf16.msra.mxu1 %v2349_v0 }
 0x1ea   :  { %2351 = vmatprep.subr.bf16.mxu1 %v2456_v44 }
 0x1ed   :  { %2353 = vmatpush1.bf16.msra.mxu1 %v2352_v3 }
 0x1ee   :  { %2354 = vmatprep.subr.bf16.mxu1 %v2456_v44 }
 0x1f1   :  { %2356 = vmatpush1.bf16.msra.mxu1 %v2355_v6 }
 0x1f2   :  { %2357 = vmatprep.subr.bf16.mxu1 %v2456_v44 }
 0x1f5   :  { %2359 = vmatpush1.bf16.msra.mxu1 %v2358_v10 }
 0x1f6   :  { %2360 = vmatprep.subr.bf16.mxu1 %v2456_v44 }
 0x1f9   :  { %2362 = vmatpush1.bf16.msra.mxu1 %v2361_v13 }
 0x1fa   :  { %2363 = vmatprep.subr.bf16.mxu1 %v2456_v44 }
 0x1fd   :  { %2365 = vmatpush1.bf16.msra.mxu1 %v2364_v18 }
 0x1fe   :  { %2366 = vmatprep.subr.bf16.mxu1 %v2456_v44 }
 0x201   :  { %2368 = vmatpush1.bf16.msra.mxu1 %v2367_v22 }
 0x202   :  { %2369 = vmatprep.subr.bf16.mxu1 %v2456_v44 }
 0x205   :  { %2371 = vmatpush1.bf16.msra.mxu1 %v2370_v25 }
 0x206   :  { %2372 = vmatprep.subr.bf16.mxu1 %v2456_v44 }
 0x209   :  { %2374 = vmatpush1.bf16.msra.mxu1 %v2373_v28 }
 0x20a   :  { %2375 = vmatprep.subr.bf16.mxu1 %v2456_v44 }
 0x20d   :  { %2377 = vmatpush1.bf16.msra.mxu1 %v2376_v32 }
 0x20e   :  { %2378 = vmatprep.subr.bf16.mxu1 %v2456_v44 }
 0x211   :  { %2380 = vmatpush1.bf16.msra.mxu1 %v2379_v35 }
 0x212   :  { %1583 = vmatprep.subr.mxu1 %v2457_v37 }
 0x215   :  { %1584 = vmatpush1.msra.mxu1 %v1376_v38 }
 0x219   :  { %v1272_v41 = vpop.f32.mrb[2].mxu0 }
 0x21a   :  { %v2387_v17 = vadd.f32 %v1272_v41, %v627_v39  ;;  %v1274_v42 = vpop.f32.mrb[3].mxu0 }
 0x21b   :  { %v2388_v43 = vadd.f32 %v1274_v42, %v631_v40 }
 0x21c   :  { %1281 = vst [vmem:[#allocation2 + $0x20] sm:$0xff] %v2387_v17 }
 0x21d   :  { %1283 = vst.msk [vmem:[#allocation2 + $0x28] sm:$0xff] %vm1282_vm0, %v2388_v43  ;;  %1628 = vmatprep.mubr.msk.f32.mxu1 %vm1282_vm0, %v2388_v43 }
 0x21e   :  { %1592 = vmatmul.mubr.f32.vlgmr.msra.gmra.mrb[6].mxu1 %v2387_v17 }
 0x239   :  { %v1661_v62 = vpop.f32.mrb[4].mxu0 }
 0x23a   :  { %v1662_v44 = vpop.f32.mrb[5].mxu0 }
 0x23b   :  { %v1663_v45 = vadd.f32 %v1662_v44, %v1661_v62 }
 0x23c   :  { %2419 = shalt.err (!%p2416_p4)
}
 0x23d   :  { %s2420_s23 = scalar_lea.hbm %s4631_s5, 768 }
 0x23e   :  { %p2421_p5 = scmp.ne.s32.totalorder %s4631_s5, %s2420_s23  ;;  %p2424_p6 = scmp.lt.u32.totalorder %s2420_s23, %s4631_s5 }
 0x240   :  { %p2426_p7 = pnand %p2424_p6, %p2421_p5 }
 0x242   :  { %2429 = shalt.err (!%p2426_p7)
}
 0x243   :  { %1608 = dma.vmem_to_hbm [thread:$0]  %s1606_s20, 768, %s4631_s5, [#allocation3]   ;;  %v1627_v8 = vld [vmem:[%s4630_s4] ss:$0 sm:$0xff]  ;;  %vm1597_vm1 = vcmask 785408  }
 0x244   :  { %v1454_v50 = vadd.f32 %v1663_v45, %v1627_v8  ;;  %s2459_s7 = smov [#allocation4]  }
 0x245   :  { %s1615_s8 = sshll.u32 %s2459_s7, 4  ;;  %s1616_s8 = int_to_ptr.vmem [resolvable:$true] %s1615_s8 }
 0x246   :  { %s2430_s9 = scalar_lea.vmem %s1616_s8, 128  ;;  %p2435_p9 = scmp.lt.s32.totalorder %s1616_s8, %s1616_s8 }
 0x247   :  { %p2431_p8 = scmp.ne.s32.totalorder %s1616_s8, %s2430_s9  ;;  %p2436_p10 = scmp.lt.s32.totalorder %s2430_s9, %s2430_s9 }
 0x249   :  { %p2437_p11 = por %p2436_p10, %p2435_p9 }
 0x24b   :  { %p2438_p12 = pnand %p2437_p11, %p2431_p8 }
 0x2af   :  { %v1696_v47 = vpop.f32.mrb[4].mxu1 }
 0x2b0   :  { %v1697_v49 = vpop.f32.mrb[5].mxu1 }
 0x2b1   :  { %v1698_v52 = vadd.f32 %v1697_v49, %v1696_v47 }
 0x2b3   :  { %v1524_v53 = vadd.f32 %v1698_v52, %v1454_v50 }
 0x2f1   :  { %v1593_v54 = vpop.f32.mrb[6].mxu1 }
 0x2f2   :  { %v1594_v55 = vadd.f32 %v1593_v54, %v1524_v53  ;;  %v1595_v56 = vpop.f32.mrb[7].mxu1 }
 0x2f4   :  { %1598 = vst.msk [vmem:[#allocation4] sm:$0xff] %vm1597_vm1, %v1594_v55 }
 0x2f5   :  { %2441 = shalt.err (!%p2438_p12)
}
 0x2f6   :  { %s2442_s10 = scalar_lea.hbm %s4632_s6, 128 }
 0x2f7   :  { %p2443_p13 = scmp.ne.s32.totalorder %s4632_s6, %s2442_s10  ;;  %p2446_p0 = scmp.lt.u32.totalorder %s2442_s10, %s4632_s6 }
 0x2f9   :  { %p2448_p1 = pnand %p2446_p0, %p2443_p13 }
 0x2fb   :  { %2451 = shalt.err (!%p2448_p1)
}
 0x2fc   :  { %1618 = dma.vmem_to_hbm [thread:$0]  %s1616_s8, 128, %s4632_s6, [#allocation5]  }
 0x2fd   :  { %2452 = dma.done.wait [#allocation3], 768  }
 0x2fe   :  { %2453 = vsyncadd [#allocation3], 4294966528 }
 0x2ff   :  { %2454 = dma.done.wait [#allocation5], 128  }
 0x300   :  { %2455 = vsyncadd [#allocation5], 4294967168 }
 0x301   :  { %1625 = vsyncpa [#allocation3], 1 }
 0x302   :  { %1626 = vsyncpa [#allocation5], 1 }

</bundles_post_ra>
